<compile_context>
chip_gen: v7x
topology: tpu7x:2x2x1
jax: 0.10.0
libtpu: 0.0.40
codegen_flags: <defaults>
</compile_context>

<pallas_src>
import math

import jax
import jax.numpy as jnp
from jax.experimental import pallas as pl
from jax.experimental.pallas import tpu as pltpu

EPS = 1e-5


# ------------------------------ fused kernel --------------------------------

def encoder_kernel(
    x_ref, send_ref, rec_ref, rec_t_ref,
    m1_w1s_ref, m1_w1r_ref, m1_b1_ref, m1_w2_ref, m1_b2_ref, m1_g_ref, m1_bt_ref,
    m2_w1_ref, m2_b1_ref, m2_w2_ref, m2_b2_ref, m2_g_ref, m2_bt_ref,
    m3_w1s_ref, m3_w1r_ref, m3_w1k_ref, m3_b1_ref, m3_w2_ref, m3_b2_ref,
    m3_g_ref, m3_bt_ref,
    fc_w_ref, fc_b_ref,
    o_ref,
):
    """Whole MLPEncoder forward in one kernel; intermediates never leave VMEM."""

    def mlp_tail(h_pre, w2, b2, gamma, beta):
        # relu -> fc2 -> relu -> BatchNorm1d (training mode, biased variance).
        h = jnp.maximum(h_pre, 0.0)
        y = jnp.dot(h, w2, preferred_element_type=jnp.float32) + b2
        y = jnp.maximum(y, 0.0)
        mean = jnp.mean(y, axis=0, keepdims=True)
        var = jnp.mean((y - mean) * (y - mean), axis=0, keepdims=True)
        inv = jax.lax.rsqrt(var + EPS)
        return gamma * (y - mean) * inv + beta

    x = x_ref[...]
    send = send_ref[...]
    rec = rec_ref[...]

    # node2edge(inputs): senders / receivers kept separate (concat folded into
    # MLP1's split W1 -> no lane-axis relayout).
    s0 = jnp.dot(send, x, preferred_element_type=jnp.float32)            # [E, D]
    r0 = jnp.dot(rec, x, preferred_element_type=jnp.float32)             # [E, D]

    # MLP1: fc1 as two partial dots (send-slab + rec-slab of W1).
    h1 = (jnp.dot(s0, m1_w1s_ref[...], preferred_element_type=jnp.float32)
          + jnp.dot(r0, m1_w1r_ref[...], preferred_element_type=jnp.float32)
          + m1_b1_ref[...])
    x_skip = mlp_tail(h1, m1_w2_ref[...], m1_b2_ref[...],
                      m1_g_ref[...], m1_bt_ref[...])                     # [E, H]

    # edge2node + MLP2.
    nodes = jnp.dot(rec_t_ref[...], x_skip,
                    preferred_element_type=jnp.float32)                  # [C, H]
    h2 = (jnp.dot(nodes, m2_w1_ref[...], preferred_element_type=jnp.float32)
          + m2_b1_ref[...])
    x2 = mlp_tail(h2, m2_w2_ref[...], m2_b2_ref[...],
                  m2_g_ref[...], m2_bt_ref[...])                         # [C, H]

    # node2edge(node features) + skip connection, with the 3H concat folded
    # into MLP3's split W1 (send / rec / skip slabs).
    s2 = jnp.dot(send, x2, preferred_element_type=jnp.float32)           # [E, H]
    r2 = jnp.dot(rec, x2, preferred_element_type=jnp.float32)            # [E, H]
    h3 = (jnp.dot(s2, m3_w1s_ref[...], preferred_element_type=jnp.float32)
          + jnp.dot(r2, m3_w1r_ref[...], preferred_element_type=jnp.float32)
          + jnp.dot(x_skip, m3_w1k_ref[...], preferred_element_type=jnp.float32)
          + m3_b1_ref[...])
    x3 = mlp_tail(h3, m3_w2_ref[...], m3_b2_ref[...],
                  m3_g_ref[...], m3_bt_ref[...])                         # [E, H]

    # fc_out fused as the kernel tail.
    o_ref[...] = (jnp.dot(x3, fc_w_ref[...], preferred_element_type=jnp.float32)
                  + fc_b_ref[...])


# ----------------------------- wrapper / glue --------------------------------

def mlp_encoder_forward(params, inputs, sp_send, sp_rec, sp_send_t, sp_rec_t):
    del sp_send_t  # edge2node only uses sp_rec_t (matches the PyTorch module).

    E, C = sp_send.shape
    D = inputs.shape[1]
    H = params["mlp"]["w2"].shape[1]
    O = params["fc_out_w"].shape[1]

    m1, m2, m3 = params["mlp"], params["mlp2"], params["mlp3"]

    operands = (
        inputs, sp_send, sp_rec, sp_rec_t,
        # MLP1 (W1 split along its input rows: [senders | receivers]).
        m1["w1"][:D], m1["w1"][D:], m1["b1"], m1["w2"], m1["b2"],
        m1["gamma"], m1["beta"],
        # MLP2.
        m2["w1"], m2["b1"], m2["w2"], m2["b2"], m2["gamma"], m2["beta"],
        # MLP3 (W1 split: [senders | receivers | skip]).
        m3["w1"][:H], m3["w1"][H:2 * H], m3["w1"][2 * H:],
        m3["b1"], m3["w2"], m3["b2"], m3["gamma"], m3["beta"],
        # fc_out.
        params["fc_out_w"], params["fc_out_b"],
    )

    vmem_spec = pl.BlockSpec(memory_space=pltpu.MemorySpace.VMEM)

    flops = 2 * (
        2 * E * C * D          # node2edge(inputs)
        + 2 * E * D * H        # MLP1 fc1 (split)
        + E * H * H            # MLP1 fc2
        + C * E * H            # edge2node
        + 2 * C * H * H        # MLP2
        + 2 * E * C * H        # node2edge(nodes)
        + 3 * E * H * H        # MLP3 fc1 (split x3)
        + E * H * H            # MLP3 fc2
        + E * H * O            # fc_out
    )
    bytes_accessed = 4 * (sum(int(a.size) for a in operands) + E * O)

    return pl.pallas_call(
        encoder_kernel,
        out_shape=jax.ShapeDtypeStruct((E, O), jnp.float32),
        in_specs=[vmem_spec] * len(operands),
        out_specs=vmem_spec,
        cost_estimate=pl.CostEstimate(flops=flops, transcendentals=0,
                                      bytes_accessed=bytes_accessed),
        compiler_params=pltpu.CompilerParams(vmem_limit_bytes=32 * 1024 * 1024),
    )(*operands)
    # TODO(synk): for production-sized graphs, tile the edge axis with a
    # "parallel" grid dim (budget VMEM against v7x's 64 MiB) and replace the
    # one-hot sp_send/sp_rec matmuls with a scalar-prefetched row gather;
    # BatchNorm would then need a cross-tile two-pass reduction.


# ----------------------------- parameter setup ------------------------------

def xavier_normal(key, fan_in, fan_out):
    std = math.sqrt(2.0 / (fan_in + fan_out))
    return std * jax.random.normal(key, (fan_in, fan_out), jnp.float32)


def make_mlp_params(key, in_dim, hid_dim, out_dim):
    k1, k2 = jax.random.split(key)
    return dict(
        w1=xavier_normal(k1, in_dim, hid_dim),
        b1=jnp.full((1, hid_dim), 0.1, jnp.float32),
        w2=xavier_normal(k2, hid_dim, out_dim),
        b2=jnp.full((1, out_dim), 0.1, jnp.float32),
        gamma=jnp.ones((1, out_dim), jnp.float32),
        beta=jnp.zeros((1, out_dim), jnp.float32),
    )


def make_encoder_params(key, input_dim, hidden_dim, output_dim):
    k1, k2, k3, k4 = jax.random.split(key, 4)
    return dict(
        mlp=make_mlp_params(k1, input_dim * 2, hidden_dim, hidden_dim),
        mlp2=make_mlp_params(k2, hidden_dim, hidden_dim, hidden_dim),
        mlp3=make_mlp_params(k3, hidden_dim * 3, hidden_dim, hidden_dim),
        fc_out_w=xavier_normal(k4, hidden_dim, output_dim),
        fc_out_b=jnp.full((1, output_dim), 0.1, jnp.float32),
    )


# ----------------------------- pure-JAX reference ----------------------------

def _mlp_ref(p, x):
    h = jax.nn.relu(x @ p["w1"] + p["b1"])
    y = jax.nn.relu(h @ p["w2"] + p["b2"])
    mean = y.mean(axis=0, keepdims=True)
    var = ((y - mean) ** 2).mean(axis=0, keepdims=True)
    return p["gamma"] * (y - mean) / jnp.sqrt(var + EPS) + p["beta"]


def encoder_ref(params, inputs, sp_send, sp_rec, sp_send_t, sp_rec_t):
    edges = jnp.concatenate([sp_send @ inputs, sp_rec @ inputs], axis=1)
    x = _mlp_ref(params["mlp"], edges)
    x_skip = x
    x = sp_rec_t @ x
    x = _mlp_ref(params["mlp2"], x)
    x = jnp.concatenate([sp_send @ x, sp_rec @ x], axis=1)
    x = jnp.concatenate([x, x_skip], axis=1)
    x = _mlp_ref(params["mlp3"], x)
    return x @ params["fc_out_w"] + params["fc_out_b"]


# --------------------------------- main --------------------------------------

if __name__ == "__main__":
    # concept_num=8 nodes, fully-connected directed graph w/o self loops
    # -> edge_num=56, embedding_dim=16, hidden_dim=32, edge_type_num=4.
    C, D, H, O = 8, 16, 32, 4

    key = jax.random.PRNGKey(0)
    k_in, k_params = jax.random.split(key)

    inputs = jax.random.normal(k_in, (C, D), jnp.float32)

    pairs = [(i, j) for i in range(C) for j in range(C) if i != j]
    send_idx = jnp.array([i for i, _ in pairs], jnp.int32)
    rec_idx = jnp.array([j for _, j in pairs], jnp.int32)
    sp_send = jax.nn.one_hot(send_idx, C, dtype=jnp.float32)   # [56, 8]
    sp_rec = jax.nn.one_hot(rec_idx, C, dtype=jnp.float32)     # [56, 8]
    sp_send_t = sp_send.T                                      # [8, 56]
    sp_rec_t = sp_rec.T                                        # [8, 56]

    params = make_encoder_params(k_params, D, H, O)

    forward = jax.jit(mlp_encoder_forward)
    out = forward(params, inputs, sp_send, sp_rec, sp_send_t, sp_rec_t)
    out = jax.block_until_ready(out)

    ref = encoder_ref(params, inputs, sp_send, sp_rec, sp_send_t, sp_rec_t)
    assert out.shape == (sp_send.shape[0], O), out.shape
    assert jnp.allclose(out, ref, rtol=1e-4, atol=1e-4), \
        float(jnp.max(jnp.abs(out - ref)))

    print("KERNEL_OK")
</pallas_src>

<mosaic_0001>
module attributes {stable_mosaic.version = 11 : i64} {
  func.func @encoder_kernel(%arg0: memref<8x16xf32, #tpu.memory_space<vmem>>, %arg1: memref<56x8xf32, #tpu.memory_space<vmem>>, %arg2: memref<56x8xf32, #tpu.memory_space<vmem>>, %arg3: memref<8x56xf32, #tpu.memory_space<vmem>>, %arg4: memref<16x32xf32, #tpu.memory_space<vmem>>, %arg5: memref<16x32xf32, #tpu.memory_space<vmem>>, %arg6: memref<1x32xf32, #tpu.memory_space<vmem>>, %arg7: memref<32x32xf32, #tpu.memory_space<vmem>>, %arg8: memref<1x32xf32, #tpu.memory_space<vmem>>, %arg9: memref<1x32xf32, #tpu.memory_space<vmem>>, %arg10: memref<1x32xf32, #tpu.memory_space<vmem>>, %arg11: memref<32x32xf32, #tpu.memory_space<vmem>>, %arg12: memref<1x32xf32, #tpu.memory_space<vmem>>, %arg13: memref<32x32xf32, #tpu.memory_space<vmem>>, %arg14: memref<1x32xf32, #tpu.memory_space<vmem>>, %arg15: memref<1x32xf32, #tpu.memory_space<vmem>>, %arg16: memref<1x32xf32, #tpu.memory_space<vmem>>, %arg17: memref<32x32xf32, #tpu.memory_space<vmem>>, %arg18: memref<32x32xf32, #tpu.memory_space<vmem>>, %arg19: memref<32x32xf32, #tpu.memory_space<vmem>>, %arg20: memref<1x32xf32, #tpu.memory_space<vmem>>, %arg21: memref<32x32xf32, #tpu.memory_space<vmem>>, %arg22: memref<1x32xf32, #tpu.memory_space<vmem>>, %arg23: memref<1x32xf32, #tpu.memory_space<vmem>>, %arg24: memref<1x32xf32, #tpu.memory_space<vmem>>, %arg25: memref<32x4xf32, #tpu.memory_space<vmem>>, %arg26: memref<1x4xf32, #tpu.memory_space<vmem>>, %arg27: memref<56x4xf32, #tpu.memory_space<vmem>>) attributes {dimension_semantics = [], scalar_prefetch = 0 : i64, scratch_operands = 0 : i64, tpu.core_type = #tpu.core_type<tc>} {
    %c0 = arith.constant 0 : index
    %c0_0 = arith.constant 0 : index
    %0 = vector.load %arg0[%c0, %c0_0] : memref<8x16xf32, #tpu.memory_space<vmem>>, vector<8x16xf32>
    %c0_1 = arith.constant 0 : index
    %c0_2 = arith.constant 0 : index
    %1 = vector.load %arg1[%c0_1, %c0_2] : memref<56x8xf32, #tpu.memory_space<vmem>>, vector<56x8xf32>
    %c0_3 = arith.constant 0 : index
    %c0_4 = arith.constant 0 : index
    %2 = vector.load %arg2[%c0_3, %c0_4] : memref<56x8xf32, #tpu.memory_space<vmem>>, vector<56x8xf32>
    %cst = arith.constant dense<0.000000e+00> : vector<56x16xf32>
    %3 = tpu.matmul %1, %0, %cst {dimension_numbers = #tpu.dot_dimension_numbers<[1], [0], [0], [1], [0, 0, 1, 1], [], []>} : vector<56x8xf32>, vector<8x16xf32>, vector<56x16xf32> -> vector<56x16xf32>
    %cst_5 = arith.constant dense<0.000000e+00> : vector<56x16xf32>
    %4 = tpu.matmul %2, %0, %cst_5 {dimension_numbers = #tpu.dot_dimension_numbers<[1], [0], [0], [1], [0, 0, 1, 1], [], []>} : vector<56x8xf32>, vector<8x16xf32>, vector<56x16xf32> -> vector<56x16xf32>
    %c0_6 = arith.constant 0 : index
    %c0_7 = arith.constant 0 : index
    %5 = vector.load %arg4[%c0_6, %c0_7] : memref<16x32xf32, #tpu.memory_space<vmem>>, vector<16x32xf32>
    %cst_8 = arith.constant dense<0.000000e+00> : vector<56x32xf32>
    %6 = tpu.matmul %3, %5, %cst_8 {dimension_numbers = #tpu.dot_dimension_numbers<[1], [0], [0], [1], [0, 0, 1, 1], [], []>} : vector<56x16xf32>, vector<16x32xf32>, vector<56x32xf32> -> vector<56x32xf32>
    %c0_9 = arith.constant 0 : index
    %c0_10 = arith.constant 0 : index
    %7 = vector.load %arg5[%c0_9, %c0_10] : memref<16x32xf32, #tpu.memory_space<vmem>>, vector<16x32xf32>
    %cst_11 = arith.constant dense<0.000000e+00> : vector<56x32xf32>
    %8 = tpu.matmul %4, %7, %cst_11 {dimension_numbers = #tpu.dot_dimension_numbers<[1], [0], [0], [1], [0, 0, 1, 1], [], []>} : vector<56x16xf32>, vector<16x32xf32>, vector<56x32xf32> -> vector<56x32xf32>
    %9 = arith.addf %6, %8 : vector<56x32xf32>
    %c0_12 = arith.constant 0 : index
    %c0_13 = arith.constant 0 : index
    %10 = vector.load %arg6[%c0_12, %c0_13] : memref<1x32xf32, #tpu.memory_space<vmem>>, vector<1x32xf32>
    %11 = vector.broadcast %10 : vector<1x32xf32> to vector<56x32xf32>
    %12 = arith.addf %9, %11 : vector<56x32xf32>
    %c0_14 = arith.constant 0 : index
    %c0_15 = arith.constant 0 : index
    %13 = vector.load %arg7[%c0_14, %c0_15] : memref<32x32xf32, #tpu.memory_space<vmem>>, vector<32x32xf32>
    %c0_16 = arith.constant 0 : index
    %c0_17 = arith.constant 0 : index
    %14 = vector.load %arg8[%c0_16, %c0_17] : memref<1x32xf32, #tpu.memory_space<vmem>>, vector<1x32xf32>
    %c0_18 = arith.constant 0 : index
    %c0_19 = arith.constant 0 : index
    %15 = vector.load %arg9[%c0_18, %c0_19] : memref<1x32xf32, #tpu.memory_space<vmem>>, vector<1x32xf32>
    %c0_20 = arith.constant 0 : index
    %c0_21 = arith.constant 0 : index
    %16 = vector.load %arg10[%c0_20, %c0_21] : memref<1x32xf32, #tpu.memory_space<vmem>>, vector<1x32xf32>
    %cst_22 = arith.constant 0.000000e+00 : f32
    %17 = vector.broadcast %cst_22 : f32 to vector<56x32xf32>
    %18 = arith.maximumf %12, %17 : vector<56x32xf32>
    %cst_23 = arith.constant dense<0.000000e+00> : vector<56x32xf32>
    %19 = tpu.matmul %18, %13, %cst_23 {dimension_numbers = #tpu.dot_dimension_numbers<[1], [0], [0], [1], [0, 0, 1, 1], [], []>} : vector<56x32xf32>, vector<32x32xf32>, vector<56x32xf32> -> vector<56x32xf32>
    %20 = vector.broadcast %14 : vector<1x32xf32> to vector<56x32xf32>
    %21 = arith.addf %19, %20 : vector<56x32xf32>
    %cst_24 = arith.constant 0.000000e+00 : f32
    %22 = vector.broadcast %cst_24 : f32 to vector<56x32xf32>
    %23 = arith.maximumf %21, %22 : vector<56x32xf32>
    %cst_25 = arith.constant dense<0.000000e+00> : vector<32xf32>
    %24 = vector.multi_reduction <add>, %23, %cst_25 [0] : vector<56x32xf32> to vector<32xf32>
    %25 = vector.shape_cast %24 : vector<32xf32> to vector<1x32xf32>
    %cst_26 = arith.constant 5.600000e+01 : f32
    %26 = vector.broadcast %cst_26 : f32 to vector<1x32xf32>
    %27 = arith.divf %25, %26 : vector<1x32xf32>
    %28 = vector.broadcast %27 : vector<1x32xf32> to vector<56x32xf32>
    %29 = arith.subf %23, %28 : vector<56x32xf32>
    %30 = vector.broadcast %27 : vector<1x32xf32> to vector<56x32xf32>
    %31 = arith.subf %23, %30 : vector<56x32xf32>
    %32 = arith.mulf %29, %31 : vector<56x32xf32>
    %cst_27 = arith.constant dense<0.000000e+00> : vector<32xf32>
    %33 = vector.multi_reduction <add>, %32, %cst_27 [0] : vector<56x32xf32> to vector<32xf32>
    %34 = vector.shape_cast %33 : vector<32xf32> to vector<1x32xf32>
    %cst_28 = arith.constant 5.600000e+01 : f32
    %35 = vector.broadcast %cst_28 : f32 to vector<1x32xf32>
    %36 = arith.divf %34, %35 : vector<1x32xf32>
    %cst_29 = arith.constant 9.99999974E-6 : f32
    %37 = vector.broadcast %cst_29 : f32 to vector<1x32xf32>
    %38 = arith.addf %36, %37 : vector<1x32xf32>
    %39 = math.rsqrt %38 : vector<1x32xf32>
    %40 = vector.broadcast %27 : vector<1x32xf32> to vector<56x32xf32>
    %41 = arith.subf %23, %40 : vector<56x32xf32>
    %42 = vector.broadcast %15 : vector<1x32xf32> to vector<56x32xf32>
    %43 = arith.mulf %42, %41 : vector<56x32xf32>
    %44 = vector.broadcast %39 : vector<1x32xf32> to vector<56x32xf32>
    %45 = arith.mulf %43, %44 : vector<56x32xf32>
    %46 = vector.broadcast %16 : vector<1x32xf32> to vector<56x32xf32>
    %47 = arith.addf %45, %46 : vector<56x32xf32>
    %c0_30 = arith.constant 0 : index
    %c0_31 = arith.constant 0 : index
    %48 = vector.load %arg3[%c0_30, %c0_31] : memref<8x56xf32, #tpu.memory_space<vmem>>, vector<8x56xf32>
    %cst_32 = arith.constant dense<0.000000e+00> : vector<8x32xf32>
    %49 = tpu.matmul %48, %47, %cst_32 {dimension_numbers = #tpu.dot_dimension_numbers<[1], [0], [0], [1], [0, 0, 1, 1], [], []>} : vector<8x56xf32>, vector<56x32xf32>, vector<8x32xf32> -> vector<8x32xf32>
    %c0_33 = arith.constant 0 : index
    %c0_34 = arith.constant 0 : index
    %50 = vector.load %arg11[%c0_33, %c0_34] : memref<32x32xf32, #tpu.memory_space<vmem>>, vector<32x32xf32>
    %cst_35 = arith.constant dense<0.000000e+00> : vector<8x32xf32>
    %51 = tpu.matmul %49, %50, %cst_35 {dimension_numbers = #tpu.dot_dimension_numbers<[1], [0], [0], [1], [0, 0, 1, 1], [], []>} : vector<8x32xf32>, vector<32x32xf32>, vector<8x32xf32> -> vector<8x32xf32>
    %c0_36 = arith.constant 0 : index
    %c0_37 = arith.constant 0 : index
    %52 = vector.load %arg12[%c0_36, %c0_37] : memref<1x32xf32, #tpu.memory_space<vmem>>, vector<1x32xf32>
    %53 = vector.broadcast %52 : vector<1x32xf32> to vector<8x32xf32>
    %54 = arith.addf %51, %53 : vector<8x32xf32>
    %c0_38 = arith.constant 0 : index
    %c0_39 = arith.constant 0 : index
    %55 = vector.load %arg13[%c0_38, %c0_39] : memref<32x32xf32, #tpu.memory_space<vmem>>, vector<32x32xf32>
    %c0_40 = arith.constant 0 : index
    %c0_41 = arith.constant 0 : index
    %56 = vector.load %arg14[%c0_40, %c0_41] : memref<1x32xf32, #tpu.memory_space<vmem>>, vector<1x32xf32>
    %c0_42 = arith.constant 0 : index
    %c0_43 = arith.constant 0 : index
    %57 = vector.load %arg15[%c0_42, %c0_43] : memref<1x32xf32, #tpu.memory_space<vmem>>, vector<1x32xf32>
    %c0_44 = arith.constant 0 : index
    %c0_45 = arith.constant 0 : index
    %58 = vector.load %arg16[%c0_44, %c0_45] : memref<1x32xf32, #tpu.memory_space<vmem>>, vector<1x32xf32>
    %cst_46 = arith.constant 0.000000e+00 : f32
    %59 = vector.broadcast %cst_46 : f32 to vector<8x32xf32>
    %60 = arith.maximumf %54, %59 : vector<8x32xf32>
    %cst_47 = arith.constant dense<0.000000e+00> : vector<8x32xf32>
    %61 = tpu.matmul %60, %55, %cst_47 {dimension_numbers = #tpu.dot_dimension_numbers<[1], [0], [0], [1], [0, 0, 1, 1], [], []>} : vector<8x32xf32>, vector<32x32xf32>, vector<8x32xf32> -> vector<8x32xf32>
    %62 = vector.broadcast %56 : vector<1x32xf32> to vector<8x32xf32>
    %63 = arith.addf %61, %62 : vector<8x32xf32>
    %cst_48 = arith.constant 0.000000e+00 : f32
    %64 = vector.broadcast %cst_48 : f32 to vector<8x32xf32>
    %65 = arith.maximumf %63, %64 : vector<8x32xf32>
    %cst_49 = arith.constant dense<0.000000e+00> : vector<32xf32>
    %66 = vector.multi_reduction <add>, %65, %cst_49 [0] : vector<8x32xf32> to vector<32xf32>
    %67 = vector.shape_cast %66 : vector<32xf32> to vector<1x32xf32>
    %cst_50 = arith.constant 8.000000e+00 : f32
    %68 = vector.broadcast %cst_50 : f32 to vector<1x32xf32>
    %69 = arith.divf %67, %68 : vector<1x32xf32>
    %70 = vector.broadcast %69 : vector<1x32xf32> to vector<8x32xf32>
    %71 = arith.subf %65, %70 : vector<8x32xf32>
    %72 = vector.broadcast %69 : vector<1x32xf32> to vector<8x32xf32>
    %73 = arith.subf %65, %72 : vector<8x32xf32>
    %74 = arith.mulf %71, %73 : vector<8x32xf32>
    %cst_51 = arith.constant dense<0.000000e+00> : vector<32xf32>
    %75 = vector.multi_reduction <add>, %74, %cst_51 [0] : vector<8x32xf32> to vector<32xf32>
    %76 = vector.shape_cast %75 : vector<32xf32> to vector<1x32xf32>
    %cst_52 = arith.constant 8.000000e+00 : f32
    %77 = vector.broadcast %cst_52 : f32 to vector<1x32xf32>
    %78 = arith.divf %76, %77 : vector<1x32xf32>
    %cst_53 = arith.constant 9.99999974E-6 : f32
    %79 = vector.broadcast %cst_53 : f32 to vector<1x32xf32>
    %80 = arith.addf %78, %79 : vector<1x32xf32>
    %81 = math.rsqrt %80 : vector<1x32xf32>
    %82 = vector.broadcast %69 : vector<1x32xf32> to vector<8x32xf32>
    %83 = arith.subf %65, %82 : vector<8x32xf32>
    %84 = vector.broadcast %57 : vector<1x32xf32> to vector<8x32xf32>
    %85 = arith.mulf %84, %83 : vector<8x32xf32>
    %86 = vector.broadcast %81 : vector<1x32xf32> to vector<8x32xf32>
    %87 = arith.mulf %85, %86 : vector<8x32xf32>
    %88 = vector.broadcast %58 : vector<1x32xf32> to vector<8x32xf32>
    %89 = arith.addf %87, %88 : vector<8x32xf32>
    %cst_54 = arith.constant dense<0.000000e+00> : vector<56x32xf32>
    %90 = tpu.matmul %1, %89, %cst_54 {dimension_numbers = #tpu.dot_dimension_numbers<[1], [0], [0], [1], [0, 0, 1, 1], [], []>} : vector<56x8xf32>, vector<8x32xf32>, vector<56x32xf32> -> vector<56x32xf32>
    %cst_55 = arith.constant dense<0.000000e+00> : vector<56x32xf32>
    %91 = tpu.matmul %2, %89, %cst_55 {dimension_numbers = #tpu.dot_dimension_numbers<[1], [0], [0], [1], [0, 0, 1, 1], [], []>} : vector<56x8xf32>, vector<8x32xf32>, vector<56x32xf32> -> vector<56x32xf32>
    %c0_56 = arith.constant 0 : index
    %c0_57 = arith.constant 0 : index
    %92 = vector.load %arg17[%c0_56, %c0_57] : memref<32x32xf32, #tpu.memory_space<vmem>>, vector<32x32xf32>
    %cst_58 = arith.constant dense<0.000000e+00> : vector<56x32xf32>
    %93 = tpu.matmul %90, %92, %cst_58 {dimension_numbers = #tpu.dot_dimension_numbers<[1], [0], [0], [1], [0, 0, 1, 1], [], []>} : vector<56x32xf32>, vector<32x32xf32>, vector<56x32xf32> -> vector<56x32xf32>
    %c0_59 = arith.constant 0 : index
    %c0_60 = arith.constant 0 : index
    %94 = vector.load %arg18[%c0_59, %c0_60] : memref<32x32xf32, #tpu.memory_space<vmem>>, vector<32x32xf32>
    %cst_61 = arith.constant dense<0.000000e+00> : vector<56x32xf32>
    %95 = tpu.matmul %91, %94, %cst_61 {dimension_numbers = #tpu.dot_dimension_numbers<[1], [0], [0], [1], [0, 0, 1, 1], [], []>} : vector<56x32xf32>, vector<32x32xf32>, vector<56x32xf32> -> vector<56x32xf32>
    %96 = arith.addf %93, %95 : vector<56x32xf32>
    %c0_62 = arith.constant 0 : index
    %c0_63 = arith.constant 0 : index
    %97 = vector.load %arg19[%c0_62, %c0_63] : memref<32x32xf32, #tpu.memory_space<vmem>>, vector<32x32xf32>
    %cst_64 = arith.constant dense<0.000000e+00> : vector<56x32xf32>
    %98 = tpu.matmul %47, %97, %cst_64 {dimension_numbers = #tpu.dot_dimension_numbers<[1], [0], [0], [1], [0, 0, 1, 1], [], []>} : vector<56x32xf32>, vector<32x32xf32>, vector<56x32xf32> -> vector<56x32xf32>
    %99 = arith.addf %96, %98 : vector<56x32xf32>
    %c0_65 = arith.constant 0 : index
    %c0_66 = arith.constant 0 : index
    %100 = vector.load %arg20[%c0_65, %c0_66] : memref<1x32xf32, #tpu.memory_space<vmem>>, vector<1x32xf32>
    %101 = vector.broadcast %100 : vector<1x32xf32> to vector<56x32xf32>
    %102 = arith.addf %99, %101 : vector<56x32xf32>
    %c0_67 = arith.constant 0 : index
    %c0_68 = arith.constant 0 : index
    %103 = vector.load %arg21[%c0_67, %c0_68] : memref<32x32xf32, #tpu.memory_space<vmem>>, vector<32x32xf32>
    %c0_69 = arith.constant 0 : index
    %c0_70 = arith.constant 0 : index
    %104 = vector.load %arg22[%c0_69, %c0_70] : memref<1x32xf32, #tpu.memory_space<vmem>>, vector<1x32xf32>
    %c0_71 = arith.constant 0 : index
    %c0_72 = arith.constant 0 : index
    %105 = vector.load %arg23[%c0_71, %c0_72] : memref<1x32xf32, #tpu.memory_space<vmem>>, vector<1x32xf32>
    %c0_73 = arith.constant 0 : index
    %c0_74 = arith.constant 0 : index
    %106 = vector.load %arg24[%c0_73, %c0_74] : memref<1x32xf32, #tpu.memory_space<vmem>>, vector<1x32xf32>
    %cst_75 = arith.constant 0.000000e+00 : f32
    %107 = vector.broadcast %cst_75 : f32 to vector<56x32xf32>
    %108 = arith.maximumf %102, %107 : vector<56x32xf32>
    %cst_76 = arith.constant dense<0.000000e+00> : vector<56x32xf32>
    %109 = tpu.matmul %108, %103, %cst_76 {dimension_numbers = #tpu.dot_dimension_numbers<[1], [0], [0], [1], [0, 0, 1, 1], [], []>} : vector<56x32xf32>, vector<32x32xf32>, vector<56x32xf32> -> vector<56x32xf32>
    %110 = vector.broadcast %104 : vector<1x32xf32> to vector<56x32xf32>
    %111 = arith.addf %109, %110 : vector<56x32xf32>
    %cst_77 = arith.constant 0.000000e+00 : f32
    %112 = vector.broadcast %cst_77 : f32 to vector<56x32xf32>
    %113 = arith.maximumf %111, %112 : vector<56x32xf32>
    %cst_78 = arith.constant dense<0.000000e+00> : vector<32xf32>
    %114 = vector.multi_reduction <add>, %113, %cst_78 [0] : vector<56x32xf32> to vector<32xf32>
    %115 = vector.shape_cast %114 : vector<32xf32> to vector<1x32xf32>
    %cst_79 = arith.constant 5.600000e+01 : f32
    %116 = vector.broadcast %cst_79 : f32 to vector<1x32xf32>
    %117 = arith.divf %115, %116 : vector<1x32xf32>
    %118 = vector.broadcast %117 : vector<1x32xf32> to vector<56x32xf32>
    %119 = arith.subf %113, %118 : vector<56x32xf32>
    %120 = vector.broadcast %117 : vector<1x32xf32> to vector<56x32xf32>
    %121 = arith.subf %113, %120 : vector<56x32xf32>
    %122 = arith.mulf %119, %121 : vector<56x32xf32>
    %cst_80 = arith.constant dense<0.000000e+00> : vector<32xf32>
    %123 = vector.multi_reduction <add>, %122, %cst_80 [0] : vector<56x32xf32> to vector<32xf32>
    %124 = vector.shape_cast %123 : vector<32xf32> to vector<1x32xf32>
    %cst_81 = arith.constant 5.600000e+01 : f32
    %125 = vector.broadcast %cst_81 : f32 to vector<1x32xf32>
    %126 = arith.divf %124, %125 : vector<1x32xf32>
    %cst_82 = arith.constant 9.99999974E-6 : f32
    %127 = vector.broadcast %cst_82 : f32 to vector<1x32xf32>
    %128 = arith.addf %126, %127 : vector<1x32xf32>
    %129 = math.rsqrt %128 : vector<1x32xf32>
    %130 = vector.broadcast %117 : vector<1x32xf32> to vector<56x32xf32>
    %131 = arith.subf %113, %130 : vector<56x32xf32>
    %132 = vector.broadcast %105 : vector<1x32xf32> to vector<56x32xf32>
    %133 = arith.mulf %132, %131 : vector<56x32xf32>
    %134 = vector.broadcast %129 : vector<1x32xf32> to vector<56x32xf32>
    %135 = arith.mulf %133, %134 : vector<56x32xf32>
    %136 = vector.broadcast %106 : vector<1x32xf32> to vector<56x32xf32>
    %137 = arith.addf %135, %136 : vector<56x32xf32>
    %c0_83 = arith.constant 0 : index
    %c0_84 = arith.constant 0 : index
    %138 = vector.load %arg25[%c0_83, %c0_84] : memref<32x4xf32, #tpu.memory_space<vmem>>, vector<32x4xf32>
    %cst_85 = arith.constant dense<0.000000e+00> : vector<56x4xf32>
    %139 = tpu.matmul %137, %138, %cst_85 {dimension_numbers = #tpu.dot_dimension_numbers<[1], [0], [0], [1], [0, 0, 1, 1], [], []>} : vector<56x32xf32>, vector<32x4xf32>, vector<56x4xf32> -> vector<56x4xf32>
    %c0_86 = arith.constant 0 : index
    %c0_87 = arith.constant 0 : index
    %140 = vector.load %arg26[%c0_86, %c0_87] : memref<1x4xf32, #tpu.memory_space<vmem>>, vector<1x4xf32>
    %141 = vector.broadcast %140 : vector<1x4xf32> to vector<56x4xf32>
    %142 = arith.addf %139, %141 : vector<56x4xf32>
    %c0_88 = arith.constant 0 : index
    %c0_89 = arith.constant 0 : index
    %143 = vector.load %arg27[%c0_88, %c0_89] : memref<56x4xf32, #tpu.memory_space<vmem>>, vector<56x4xf32>
    tpu.vector_store %arg27[%c0_88, %c0_89], %142 {strides = array<i32>} : memref<56x4xf32, #tpu.memory_space<vmem>>, vector<56x4xf32>,
    return
  }
}

</mosaic_0001>

<bundles_post_ra>
// kernel: mlp_encoder_forward.1
= control target key start
LH: loop header
LB: loop body
LE: loop exit
PB: predicated region body
PF: predicated region fallthrough
CT: control target
= control target key end

     0   :  { %vm101_vm0 = vcmask 64512   ;;  %v2767_v0 = vmov 0.0   ;;  %vm2768_vm1 = vmmov 0   ;;  %v2769_v5 = vmov 0.0|0.0   ;;  %s3534_s0 = inlined_call_operand.vmem [shape: f32[8,16], index: 0, kind: input, shape index: {}]   ;;  %s3535_s1 = inlined_call_operand.vmem [shape: f32[56,8], index: 1, kind: input, shape index: {}]   ;;  %s3536_s2 = inlined_call_operand.vmem [shape: f32[56,8], index: 2, kind: input, shape index: {}]   ;;  %s3537_s4 = inlined_call_operand.vmem [shape: f32[16,32], index: 4, kind: input, shape index: {}]   ;;  %s3538_s5 = inlined_call_operand.vmem [shape: f32[16,32], index: 5, kind: input, shape index: {}]   ;;  %s3539_s7 = inlined_call_operand.vmem [shape: f32[32,32], index: 7, kind: input, shape index: {}]   ;;  %s3540_s6 = inlined_call_operand.vmem [shape: f32[1,32], index: 6, kind: input, shape index: {}]   ;;  %s3541_s8 = inlined_call_operand.vmem [shape: f32[1,32], index: 8, kind: input, shape index: {}]   ;;  %s3542_s9 = inlined_call_operand.vmem [shape: f32[1,32], index: 9, kind: input, shape index: {}]   ;;  %s3543_s10 = inlined_call_operand.vmem [shape: f32[1,32], index: 10, kind: input, shape index: {}]   ;;  %s3544_s11 = inlined_call_operand.vmem [shape: f32[32,32], index: 11, kind: input, shape index: {}]   ;;  %s3545_s3 = inlined_call_operand.vmem [shape: f32[8,56], index: 3, kind: input, shape index: {}]   ;;  %s3546_s13 = inlined_call_operand.vmem [shape: f32[32,32], index: 13, kind: input, shape index: {}]   ;;  %s3547_s12 = inlined_call_operand.vmem [shape: f32[1,32], index: 12, kind: input, shape index: {}]   ;;  %s3548_s14 = inlined_call_operand.vmem [shape: f32[1,32], index: 14, kind: input, shape index: {}]   ;;  %s3549_s15 = inlined_call_operand.vmem [shape: f32[1,32], index: 15, kind: input, shape index: {}]   ;;  %s3550_s16 = inlined_call_operand.vmem [shape: f32[1,32], index: 16, kind: input, shape index: {}]   ;;  %s3551_s18 = inlined_call_operand.vmem [shape: f32[32,32], index: 18, kind: input, shape index: {}]   ;;  %s3552_s17 = inlined_call_operand.vmem [shape: f32[32,32], index: 17, kind: input, shape index: {}]   ;;  %s3553_s19 = inlined_call_operand.vmem [shape: f32[32,32], index: 19, kind: input, shape index: {}]   ;;  %s3554_s21 = inlined_call_operand.vmem [shape: f32[32,32], index: 21, kind: input, shape index: {}]   ;;  %s3555_s20 = inlined_call_operand.vmem [shape: f32[1,32], index: 20, kind: input, shape index: {}]   ;;  %s3556_s25 = inlined_call_operand.vmem [shape: f32[32,4], index: 25, kind: input, shape index: {}]   ;;  %s3557_s22 = inlined_call_operand.vmem [shape: f32[1,32], index: 22, kind: input, shape index: {}]   ;;  %s3558_s23 = inlined_call_operand.vmem [shape: f32[1,32], index: 23, kind: input, shape index: {}]   ;;  %s3559_s24 = inlined_call_operand.vmem [shape: f32[1,32], index: 24, kind: input, shape index: {}]   ;;  %s3560_s26 = inlined_call_operand.vmem [shape: f32[1,4], index: 26, kind: input, shape index: {}]   ;;  %s3561_s27 = inlined_call_operand.vmem [shape: f32[56,4], index: 27, kind: output, shape index: {}]  }
   0x1   :  { %3568 = sst [smem:[#allocation2_spill]] %s3534_s0  ;;  %2338 = vmatprep.subr.mxu0 %v2767_v0  ;;  %2340 = vmatprep.mubr.msk.f32.mxu0 %vm2768_vm1, %v2767_v0  ;;  %vm348_vm2 = vcmask 130048   ;;  %vm625_vm3 = vcmask 261120   ;;  %vm845_vm4 = vcmask 457728   ;;  %vm2092_vm5 = vcmask 31744  }
   0x2   :  { %3569 = sst [smem:[#allocation3_spill]] %s3535_s1  ;;  %2756 = vmatprep.subr.mxu1 %v2767_v0  ;;  %2369 = vmatprep.mubr.msk.f32.mxu1 %vm2768_vm1, %v2767_v0 }
   0x3   :  { %3570 = sst [smem:[#allocation4_spill]] %s3536_s2 }
   0x4   :  { %3571 = sst [smem:[#allocation5_spill]] %s3537_s4  ;;  %s3582_s1 = sld [smem:[#allocation4_spill]] }
   0x5   :  { %3572 = sst [smem:[#allocation6_spill]] %s3538_s5  ;;  %s3583_s2 = sld [smem:[#allocation5_spill]] }
   0x6   :  { %3573 = sst [smem:[#allocation7_spill]] %s3539_s7  ;;  %s3581_s7 = sld [smem:[#allocation3_spill]] }
   0x7   :  { %3574 = sst [smem:[#allocation8_spill]] %s3540_s6 }
   0x8   :  { %3575 = sst [smem:[#allocation9_spill]] %s3541_s8 }
   0x9   :  { %3576 = sst [smem:[#allocation10_spill]] %s3542_s9  ;;  %s3587_s8 = sld [smem:[#allocation9_spill]] }
   0xa   :  { %3577 = sst [smem:[#allocation11_spill]] %s3543_s10  ;;  %s3580_s9 = sld [smem:[#allocation2_spill]]  ;;  %v2935_v4 = vld [vmem:[%s3582_s1 + $0x10] sm:$0xff]  ;;  %v2955_v8 = vld [vmem:[%s3582_s1 + $0x18] sm:$0xff]  ;;  %v2975_v11 = vld [vmem:[%s3582_s1 + $0x20] sm:$0xff] }
   0xb   :  { %3578 = sst [smem:[#allocation12_spill]] %s3544_s11  ;;  %v344_v6 = vld [vmem:[%s3583_s2] sm:$0xff]  ;;  %v345_v7 = vld [vmem:[%s3583_s2 + $0x8] sm:$0xff]  ;;  %v3011_v15 = vld [vmem:[%s3582_s1 + $0x30] sm:$0xff]  ;;  %s3584_s2 = sld [smem:[#allocation6_spill]] }
   0xc   :  { %3579 = sst [smem:[#allocation13_spill]] %s3545_s3  ;;  %v2919_v2 = vld [vmem:[%s3581_s7] sm:$0xff]  ;;  %v2930_v3 = vld [vmem:[%s3581_s7 + $0x8] sm:$0xff]  ;;  %v2697_v9 = vpack.c.bf16 %v345_v7, %v344_v6  ;;  %v2962_v10 = vld [vmem:[%s3581_s7 + $0x10] sm:$0xff]  ;;  %s3586_s3 = sld [smem:[#allocation8_spill]] }
   0xd   :  { %v2982_v12 = vld [vmem:[%s3581_s7 + $0x18] sm:$0xff]  ;;  %v2993_v13 = vld [vmem:[%s3582_s1 + $0x28] sm:$0xff]  ;;  %v3000_v14 = vld [vmem:[%s3581_s7 + $0x20] sm:$0xff]  ;;  %s3589_s28 = sld [smem:[#allocation11_spill]]  ;;  %s3590_s29 = sld [smem:[#allocation12_spill]] }
   0xe   :  { %v3018_v16 = vld [vmem:[%s3581_s7 + $0x28] sm:$0xff]  ;;  %v3031_v17 = vld [vmem:[%s3581_s7 + $0x30] sm:$0xff]  ;;  %v3040_v18 = vld [vmem:[%s3582_s1] sm:$0xff]  ;;  %s3591_s4 = sld [smem:[#allocation13_spill]] }
   0xf   :  { %v3049_v19 = vld [vmem:[%s3582_s1 + $0x8] sm:$0xff] }
  0x10   :  { %v86_v1 = vld [vmem:[%s3580_s9] sm:$0xff]  ;;  %s3585_s9 = sld [smem:[#allocation7_spill]] }
  0x11   :  { %2339 = vmatpush3.msra.mxu0 %v86_v1  ;;  %2757 = vmatpush3.msra.mxu1 %v86_v1  ;;  %v346_v20 = vld [vmem:[%s3584_s2] sm:$0xff]  ;;  %v347_v21 = vld [vmem:[%s3584_s2 + $0x8] sm:$0xff] }
  0x12   :  { %2341 = vmatmul.mubr.msk.f32.vlgmr.msra.gmra.mrb[0].mxu0 %vm101_vm0, %v2919_v2  ;;  %2361 = vmatprep.subr.mxu0 %v2767_v0  ;;  %v2694_v22 = vpack.c.bf16 %v347_v21, %v346_v20 }
  0x13   :  { %2343 = vmatprep.mubr.msk.f32.mxu0 %vm2768_vm1, %v2767_v0  ;;  %2362 = vmatpush3.msra.mxu0 %v86_v1 }
  0x14   :  { %2370 = vmatmul.mubr.msk.f32.vlgmr.msra.gmra.mrb[0].mxu1 %vm101_vm0, %v2935_v4  ;;  %2696 = vmatprep.subr.bf16.mxu1 %v2769_v5 }
  0x15   :  { %2372 = vmatprep.mubr.msk.f32.mxu1 %vm2768_vm1, %v2767_v0  ;;  %2693 = vmatprep.subr.bf16.mxu0 %v2769_v5 }
  0x16   :  { %2344 = vmatmul.mubr.msk.f32.gmra.mrb[2].mxu0 %vm101_vm0, %v2930_v3  ;;  %2698 = vmatpush3.bf16.msra.mxu1 %v2697_v9  ;;  %v605_v51 = vld [vmem:[%s3585_s9] sm:$0xff]  ;;  %v606_v52 = vld [vmem:[%s3585_s9 + $0x8] sm:$0xff]  ;;  %v607_v54 = vld [vmem:[%s3585_s9 + $0x10] sm:$0xff] }
  0x17   :  { %2346 = vmatprep.mubr.msk.f32.mxu0 %vm2768_vm1, %v2767_v0  ;;  %2705 = vmatprep.subr.bf16.mxu1 %v2769_v5  ;;  %v2700_v53 = vpack.c.bf16 %v606_v52, %v605_v51  ;;  %v608_v55 = vld [vmem:[%s3585_s9 + $0x18] sm:$0xff]  ;;  %s3588_s9 = sld [smem:[#allocation10_spill]] }
  0x18   :  { %2373 = vmatmul.mubr.msk.f32.gmra.mrb[2].mxu1 %vm101_vm0, %v2955_v8  ;;  %v2703_v56 = vpack.c.bf16 %v608_v55, %v607_v54 }
  0x19   :  { %2375 = vmatprep.mubr.msk.f32.mxu1 %vm2768_vm1, %v2767_v0 }
  0x1a   :  { %2347 = vmatmul.mubr.msk.f32.gmra.mrb[4].mxu0 %vm101_vm0, %v2962_v10 }
  0x1b   :  { %2349 = vmatprep.mubr.msk.f32.mxu0 %vm2768_vm1, %v2767_v0 }
  0x1c   :  { %2376 = vmatmul.mubr.msk.f32.gmra.mrb[4].mxu1 %vm101_vm0, %v2975_v11 }
  0x1d   :  { %2378 = vmatprep.mubr.msk.f32.mxu1 %vm2768_vm1, %v2767_v0 }
  0x1e   :  { %2350 = vmatmul.mubr.msk.f32.gmra.mrb[6].mxu0 %vm101_vm0, %v2982_v12 }
  0x1f   :  { %2352 = vmatprep.mubr.msk.f32.mxu0 %vm2768_vm1, %v2767_v0 }
  0x20   :  { %2379 = vmatmul.mubr.msk.f32.gmra.mrb[6].mxu1 %vm101_vm0, %v2993_v13 }
  0x21   :  { %2381 = vmatprep.mubr.msk.f32.mxu1 %vm2768_vm1, %v2767_v0 }
  0x22   :  { %2353 = vmatmul.mubr.msk.f32.gmra.mrb[8].mxu0 %vm101_vm0, %v3000_v14 }
  0x23   :  { %2355 = vmatprep.mubr.msk.f32.mxu0 %vm2768_vm1, %v2767_v0 }
  0x24   :  { %2382 = vmatmul.mubr.msk.f32.gmra.mrb[8].mxu1 %vm101_vm0, %v3011_v15 }
  0x25   :  { %2413 = vmatprep.mubr.msk.f32.mxu1 %vm2768_vm1, %v2767_v0 }
  0x26   :  { %2356 = vmatmul.mubr.msk.f32.gmra.mrb[10].mxu0 %vm101_vm0, %v3018_v16 }
  0x27   :  { %2358 = vmatprep.mubr.msk.f32.mxu0 %vm2768_vm1, %v2767_v0 }
  0x2a   :  { %2359 = vmatmul.mubr.msk.f32.gmra.mrb[12].mxu0 %vm101_vm0, %v3031_v17 }
  0x2b   :  { %2363 = vmatprep.mubr.msk.f32.mxu0 %vm2768_vm1, %v2767_v0 }
  0x2e   :  { %2364 = vmatmul.mubr.msk.f32.vlgmr.msra.gmra.mrb[14].mxu0 %vm101_vm0, %v3040_v18 }
  0x2f   :  { %2366 = vmatprep.mubr.msk.f32.mxu0 %vm2768_vm1, %v2767_v0  ;;  %2695 = vmatpush3.bf16.msra.mxu0 %v2694_v22 }
  0x30   :  { %2699 = vmatprep.subr.bf16.mxu0 %v2769_v5 }
  0x32   :  { %2367 = vmatmul.mubr.msk.f32.gmra.mrb[16].mxu0 %vm101_vm0, %v3049_v19 }
  0x33   :  { %2388 = vmatprep.mubr.msk.f32.mxu0 %vm2768_vm1, %v2767_v0 }
  0xe5   :  { %v189_v23 = vpop.f32.mrb[0].mxu0 }
  0xe6   :  { %v2342_v24 = vpop.f32.mrb[1].mxu0  ;;  %2414 = vmatmul.mubr.msk.f32.vlgmr.msra.gmra.mrb[10].mxu1 %vm348_vm2, %v189_v23 }
  0xe7   :  { %2416 = vmatprep.mubr.msk.f32.mxu1 %vm2768_vm1, %v2767_v0  ;;  %v320_v25 = vpop.f32.mrb[0].mxu1  ;;  %v2132_v24 = vld [vmem:[%s3586_s3] ss:$0 sm:$0xff] }
  0xe8   :  { %v2371_v27 = vpop.f32.mrb[1].mxu1 }
  0xe9   :  { %v194_v26 = vpop.f32.mrb[2].mxu0 }
  0xea   :  { %v2345_v28 = vpop.f32.mrb[3].mxu0  ;;  %2417 = vmatmul.mubr.msk.f32.gmra.mrb[12].mxu1 %vm348_vm2, %v194_v26 }
  0xeb   :  { %2419 = vmatprep.mubr.msk.f32.mxu1 %vm2768_vm1, %v2767_v0  ;;  %v325_v29 = vpop.f32.mrb[2].mxu1 }
  0xec   :  { %v2374_v31 = vpop.f32.mrb[3].mxu1 }
  0xed   :  { %v199_v30 = vpop.f32.mrb[4].mxu0 }
  0xee   :  { %v2348_v32 = vpop.f32.mrb[5].mxu0  ;;  %2420 = vmatmul.mubr.msk.f32.gmra.mrb[14].mxu1 %vm348_vm2, %v199_v30 }
  0xef   :  { %2422 = vmatprep.mubr.msk.f32.mxu1 %vm2768_vm1, %v2767_v0  ;;  %v330_v33 = vpop.f32.mrb[4].mxu1 }
  0xf0   :  { %v2377_v35 = vpop.f32.mrb[5].mxu1 }
  0xf1   :  { %v204_v34 = vpop.f32.mrb[6].mxu0 }
  0xf2   :  { %v2351_v36 = vpop.f32.mrb[7].mxu0  ;;  %2423 = vmatmul.mubr.msk.f32.gmra.mrb[16].mxu1 %vm348_vm2, %v204_v34 }
  0xf3   :  { %2425 = vmatprep.mubr.msk.f32.mxu1 %vm2768_vm1, %v2767_v0  ;;  %v335_v37 = vpop.f32.mrb[6].mxu1 }
  0xf4   :  { %v2380_v39 = vpop.f32.mrb[7].mxu1 }
  0xf5   :  { %v209_v38 = vpop.f32.mrb[8].mxu0 }
  0xf6   :  { %v2354_v40 = vpop.f32.mrb[9].mxu0  ;;  %2426 = vmatmul.mubr.msk.f32.gmra.mrb[18].mxu1 %vm348_vm2, %v209_v38 }
  0xf7   :  { %2428 = vmatprep.mubr.msk.f32.mxu1 %vm2768_vm1, %v2767_v0  ;;  %v340_v41 = vpop.f32.mrb[8].mxu1 }
  0xf8   :  { %v2383_v43 = vpop.f32.mrb[9].mxu1 }
  0xf9   :  { %v214_v42 = vpop.f32.mrb[10].mxu0 }
  0xfa   :  { %v2357_v44 = vpop.f32.mrb[11].mxu0  ;;  %2429 = vmatmul.mubr.msk.f32.gmra.mrb[20].mxu1 %vm348_vm2, %v214_v42 }
  0xfb   :  { %2431 = vmatprep.mubr.msk.f32.mxu1 %vm2768_vm1, %v2767_v0 }
  0xfd   :  { %v219_v45 = vpop.f32.mrb[12].mxu0 }
  0xfe   :  { %v2360_v46 = vpop.f32.mrb[13].mxu0  ;;  %2432 = vmatmul.mubr.msk.f32.gmra.mrb[22].mxu1 %vm348_vm2, %v219_v45 }
  0xff   :  { %2477 = vmatprep.mubr.msk.f32.mxu1 %vm2768_vm1, %v2767_v0 }
 0x101   :  { %v310_v47 = vpop.f32.mrb[14].mxu0 }
 0x102   :  { %v2365_v48 = vpop.f32.mrb[15].mxu0  ;;  %2389 = vmatmul.mubr.msk.f32.vlgmr.msra.gmra.mrb[18].mxu0 %vm348_vm2, %v310_v47 }
 0x103   :  { %2391 = vmatprep.mubr.msk.f32.mxu0 %vm2768_vm1, %v2767_v0  ;;  %2701 = vmatpush3.bf16.msra.mxu0 %v2700_v53 }
 0x104   :  { %2702 = vmatprep.subr.bf16.mxu0 %v2769_v5 }
 0x105   :  { %v315_v49 = vpop.f32.mrb[16].mxu0 }
 0x106   :  { %v2368_v50 = vpop.f32.mrb[17].mxu0  ;;  %2392 = vmatmul.mubr.msk.f32.gmra.mrb[20].mxu0 %vm348_vm2, %v315_v49 }
 0x107   :  { %2394 = vmatprep.mubr.msk.f32.mxu0 %vm2768_vm1, %v2767_v0  ;;  %2704 = vmatpush3.bf16.msra.mxu0 %v2703_v56 }
 0x108   :  { %2525 = vmatprep.subr.mxu0 %v2767_v0 }
 0x10a   :  { %2395 = vmatmul.mubr.msk.f32.gmra.mrb[22].mxu0 %vm348_vm2, %v320_v25 }
 0x10b   :  { %2397 = vmatprep.mubr.msk.f32.mxu0 %vm2768_vm1, %v2767_v0 }
 0x10e   :  { %2398 = vmatmul.mubr.msk.f32.gmra.mrb[24].mxu0 %vm348_vm2, %v325_v29 }
 0x10f   :  { %2400 = vmatprep.mubr.msk.f32.mxu0 %vm2768_vm1, %v2767_v0 }
 0x112   :  { %2401 = vmatmul.mubr.msk.f32.gmra.mrb[26].mxu0 %vm348_vm2, %v330_v33 }
 0x113   :  { %2403 = vmatprep.mubr.msk.f32.mxu0 %vm2768_vm1, %v2767_v0 }
 0x116   :  { %2404 = vmatmul.mubr.msk.f32.gmra.mrb[28].mxu0 %vm348_vm2, %v335_v37 }
 0x117   :  { %2406 = vmatprep.mubr.msk.f32.mxu0 %vm2768_vm1, %v2767_v0 }
 0x11a   :  { %2407 = vmatmul.mubr.msk.f32.gmra.mrb[30].mxu0 %vm348_vm2, %v340_v41 }
 0x11b   :  { %2442 = vmatprep.mubr.msk.f32.mxu0 %vm2768_vm1, %v2767_v0 }
 0x1b9   :  { %v557_v57 = vpop.f32.mrb[10].mxu1 }
 0x1ba   :  { %v2415_v58 = vpop.f32.mrb[11].mxu1 }
 0x1bd   :  { %v562_v59 = vpop.f32.mrb[12].mxu1 }
 0x1be   :  { %v2418_v60 = vpop.f32.mrb[13].mxu1 }
 0x1c1   :  { %v567_v61 = vpop.f32.mrb[14].mxu1 }
 0x1c2   :  { %v2421_v62 = vpop.f32.mrb[15].mxu1 }
 0x1c5   :  { %v572_v63 = vpop.f32.mrb[16].mxu1 }
 0x1c6   :  { %v2424_v1 = vpop.f32.mrb[17].mxu1 }
 0x1c9   :  { %v577_v6 = vpop.f32.mrb[18].mxu1 }
 0x1ca   :  { %v2427_v7 = vpop.f32.mrb[19].mxu1 }
 0x1cd   :  { %v582_v9 = vpop.f32.mrb[20].mxu1 }
 0x1ce   :  { %v2430_v20 = vpop.f32.mrb[21].mxu1 }
 0x1d1   :  { %v587_v21 = vpop.f32.mrb[22].mxu1 }
 0x1d2   :  { %v2433_v22 = vpop.f32.mrb[23].mxu1 }
 0x1d5   :  { %v436_v23 = vpop.f32.mrb[18].mxu0 }
 0x1d6   :  { %v558_v25 = vadd.f32 %v557_v57, %v436_v23  ;;  %v2390_v26 = vpop.f32.mrb[19].mxu0 }
 0x1d8   :  { %v598_v27 = vadd.f32 %v2132_v24, %v558_v25 }
 0x1d9   :  { %v441_v28 = vpop.f32.mrb[20].mxu0 }
 0x1da   :  { %v612_v29 = vmax.f32 %v598_v27, 0.0  ;;  %v563_v30 = vadd.f32 %v562_v59, %v441_v28  ;;  %v2393_v31 = vpop.f32.mrb[21].mxu0  ;;  %v2133_v59 = vld [vmem:[%s3587_s8] ss:$0 sm:$0xff] }
 0x1dc   :  { %v599_v32 = vadd.f32 %v2132_v24, %v563_v30  ;;  %2443 = vmatmul.mubr.msk.f32.vlgmr.msra.gmra.mrb[32].mxu0 %vm625_vm3, %v612_v29 }
 0x1dd   :  { %v446_v33 = vpop.f32.mrb[22].mxu0  ;;  %2445 = vmatprep.mubr.msk.f32.mxu0 %vm2768_vm1, %v2767_v0 }
 0x1de   :  { %v613_v34 = vmax.f32 %v599_v32, 0.0  ;;  %v568_v35 = vadd.f32 %v567_v61, %v446_v33  ;;  %v2396_v36 = vpop.f32.mrb[23].mxu0 }
 0x1e0   :  { %v600_v37 = vadd.f32 %v2132_v24, %v568_v35  ;;  %2446 = vmatmul.mubr.msk.f32.gmra.mrb[34].mxu0 %vm625_vm3, %v613_v34 }
 0x1e1   :  { %v451_v38 = vpop.f32.mrb[24].mxu0  ;;  %2448 = vmatprep.mubr.msk.f32.mxu0 %vm2768_vm1, %v2767_v0 }
 0x1e2   :  { %v614_v39 = vmax.f32 %v600_v37, 0.0  ;;  %v573_v40 = vadd.f32 %v572_v63, %v451_v38  ;;  %v2399_v41 = vpop.f32.mrb[25].mxu0 }
 0x1e4   :  { %v601_v42 = vadd.f32 %v2132_v24, %v573_v40  ;;  %2449 = vmatmul.mubr.msk.f32.gmra.mrb[36].mxu0 %vm625_vm3, %v614_v39 }
 0x1e5   :  { %v456_v43 = vpop.f32.mrb[26].mxu0  ;;  %2451 = vmatprep.mubr.msk.f32.mxu0 %vm2768_vm1, %v2767_v0 }
 0x1e6   :  { %v615_v44 = vmax.f32 %v601_v42, 0.0  ;;  %v578_v45 = vadd.f32 %v577_v6, %v456_v43  ;;  %v2402_v46 = vpop.f32.mrb[27].mxu0 }
 0x1e8   :  { %v602_v47 = vadd.f32 %v2132_v24, %v578_v45  ;;  %2452 = vmatmul.mubr.msk.f32.gmra.mrb[38].mxu0 %vm625_vm3, %v615_v44 }
 0x1e9   :  { %v461_v48 = vpop.f32.mrb[28].mxu0  ;;  %2454 = vmatprep.mubr.msk.f32.mxu0 %vm2768_vm1, %v2767_v0 }
 0x1ea   :  { %v616_v49 = vmax.f32 %v602_v47, 0.0  ;;  %v583_v50 = vadd.f32 %v582_v9, %v461_v48  ;;  %v2405_v51 = vpop.f32.mrb[29].mxu0 }
 0x1ec   :  { %v603_v52 = vadd.f32 %v2132_v24, %v583_v50  ;;  %2455 = vmatmul.mubr.msk.f32.gmra.mrb[40].mxu0 %vm625_vm3, %v616_v49 }
 0x1ed   :  { %v466_v53 = vpop.f32.mrb[30].mxu0  ;;  %2457 = vmatprep.mubr.msk.f32.mxu0 %vm2768_vm1, %v2767_v0 }
 0x1ee   :  { %v617_v54 = vmax.f32 %v603_v52, 0.0  ;;  %v588_v55 = vadd.f32 %v587_v21, %v466_v53  ;;  %v2408_v56 = vpop.f32.mrb[31].mxu0 }
 0x1f0   :  { %v604_v57 = vadd.f32 %v2132_v24, %v588_v55  ;;  %2458 = vmatmul.mubr.msk.f32.gmra.mrb[42].mxu0 %vm625_vm3, %v617_v54 }
 0x1f1   :  { %2460 = vmatprep.mubr.msk.f32.mxu0 %vm2768_vm1, %v2767_v0 }
 0x1f2   :  { %v618_v58 = vmax.f32 %v604_v57, 0.0 }
 0x1f4   :  { %2461 = vmatmul.mubr.msk.f32.gmra.mrb[44].mxu0 %vm625_vm3, %v618_v58 }
 0x1f5   :  { %2527 = vmatprep.mubr.msk.f32.mxu0 %vm2768_vm1, %v2767_v0 }
 0x2af   :  { %v713_v60 = vpop.f32.mrb[32].mxu0 }
 0x2b0   :  { %v714_v61 = vadd.f32 %v2133_v59, %v713_v60  ;;  %v2444_v62 = vpop.f32.mrb[33].mxu0 }
 0x2b2   :  { %v747_v1 = vmax.f32 %v714_v61, 0.0 }
 0x2b3   :  { %v718_v63 = vpop.f32.mrb[34].mxu0 }
 0x2b4   :  { %v719_v6 = vadd.f32 %v2133_v59, %v718_v63  ;;  %v2447_v7 = vpop.f32.mrb[35].mxu0  ;;  %v754_v21 = vsel %vm625_vm3, %v747_v1, 0.0 }
 0x2b6   :  { %v748_v9 = vmax.f32 %v719_v6, 0.0 }
 0x2b7   :  { %v723_v20 = vpop.f32.mrb[36].mxu0 }
 0x2b8   :  { %v755_v22 = vsel %vm625_vm3, %v748_v9, 0.0  ;;  %v724_v23 = vadd.f32 %v2133_v59, %v723_v20  ;;  %v2450_v24 = vpop.f32.mrb[37].mxu0 }
 0x2b9   :  { %v756_v25 = vadd.f32 %v755_v22, %v754_v21 }
 0x2ba   :  { %v749_v26 = vmax.f32 %v724_v23, 0.0 }
 0x2bb   :  { %v728_v27 = vpop.f32.mrb[38].mxu0 }
 0x2bc   :  { %v757_v28 = vsel %vm625_vm3, %v749_v26, 0.0  ;;  %v729_v29 = vadd.f32 %v2133_v59, %v728_v27  ;;  %v2453_v30 = vpop.f32.mrb[39].mxu0 }
 0x2bd   :  { %v758_v31 = vadd.f32 %v757_v28, %v756_v25 }
 0x2be   :  { %v750_v32 = vmax.f32 %v729_v29, 0.0 }
 0x2bf   :  { %v733_v33 = vpop.f32.mrb[40].mxu0 }
 0x2c0   :  { %v759_v34 = vsel %vm625_vm3, %v750_v32, 0.0  ;;  %v734_v35 = vadd.f32 %v2133_v59, %v733_v33  ;;  %v2456_v36 = vpop.f32.mrb[41].mxu0 }
 0x2c1   :  { %v760_v37 = vadd.f32 %v759_v34, %v758_v31 }
 0x2c2   :  { %v751_v38 = vmax.f32 %v734_v35, 0.0 }
 0x2c3   :  { %v738_v39 = vpop.f32.mrb[42].mxu0 }
 0x2c4   :  { %v761_v40 = vsel %vm625_vm3, %v751_v38, 0.0  ;;  %v739_v41 = vadd.f32 %v2133_v59, %v738_v39  ;;  %v2459_v42 = vpop.f32.mrb[43].mxu0 }
 0x2c5   :  { %v762_v43 = vadd.f32 %v761_v40, %v760_v37 }
 0x2c6   :  { %v752_v44 = vmax.f32 %v739_v41, 0.0 }
 0x2c7   :  { %v743_v45 = vpop.f32.mrb[44].mxu0 }
 0x2c8   :  { %v763_v46 = vsel %vm625_vm3, %v752_v44, 0.0  ;;  %v744_v47 = vadd.f32 %v2133_v59, %v743_v45  ;;  %v2462_v48 = vpop.f32.mrb[45].mxu0 }
 0x2c9   :  { %v764_v49 = vadd.f32 %v763_v46, %v762_v43 }
 0x2ca   :  { %v753_v50 = vmax.f32 %v744_v47, 0.0  ;;  %v2141_v47 = vld [vmem:[%s3588_s9] ss:$0 sm:$0xff] }
 0x2cc   :  { %v765_v51 = vsel %vm625_vm3, %v753_v50, 0.0 }
 0x2cd   :  { %v766_v52 = vadd.f32 %v765_v51, %v764_v49 }
 0x2cf   :  { %v767_v53 = vrot.slane %v766_v52, 4 }
 0x2d1   :  { %v768_v54 = vadd.f32 %v767_v53, %v766_v52  ;;  %v2142_v53 = vld [vmem:[%s3589_s28] ss:$0 sm:$0xff] }
 0x2d3   :  { %v769_v55 = vrot.slane %v768_v54, 2 }
 0x2d5   :  { %v770_v56 = vadd.f32 %v769_v55, %v768_v54 }
 0x2d7   :  { %v771_v57 = vrot.slane %v770_v56, 1 }
 0x2d9   :  { %v772_v58 = vadd.f32 %v771_v57, %v770_v56 }
 0x2db   :  { %v774_v60 = vmul.f32 0.017857144, %v772_v58 }
 0x2dd   :  { %v775_v61 = vsub.f32 %v747_v1, %v774_v60  ;;  %v776_v62 = vsub.f32 %v748_v9, %v774_v60  ;;  %v777_v63 = vsub.f32 %v749_v26, %v774_v60  ;;  %v778_v6 = vsub.f32 %v750_v32, %v774_v60 }
 0x2de   :  { %v779_v7 = vsub.f32 %v751_v38, %v774_v60  ;;  %v780_v20 = vsub.f32 %v752_v44, %v774_v60  ;;  %v781_v59 = vsub.f32 %v753_v50, %v774_v60 }
 0x2df   :  { %v782_v21 = vmul.f32 %v775_v61, %v775_v61  ;;  %v783_v22 = vmul.f32 %v776_v62, %v776_v62  ;;  %v784_v23 = vmul.f32 %v777_v63, %v777_v63  ;;  %v785_v24 = vmul.f32 %v778_v6, %v778_v6 }
 0x2e0   :  { %v786_v29 = vmul.f32 %v779_v7, %v779_v7  ;;  %v787_v1 = vmul.f32 %v780_v20, %v780_v20  ;;  %v788_v32 = vmul.f32 %v781_v59, %v781_v59  ;;  %v823_v48 = vmul.f32 %v2141_v47, %v781_v59 }
 0x2e1   :  { %v789_v25 = vsel %vm625_vm3, %v782_v21, 0.0  ;;  %v790_v27 = vsel %vm625_vm3, %v783_v22, 0.0  ;;  %v792_v30 = vsel %vm625_vm3, %v784_v23, 0.0  ;;  %v794_v9 = vsel %vm625_vm3, %v785_v24, 0.0 }
 0x2e2   :  { %v791_v28 = vadd.f32 %v790_v27, %v789_v25  ;;  %v796_v33 = vsel %vm625_vm3, %v786_v29, 0.0  ;;  %v798_v35 = vsel %vm625_vm3, %v787_v1, 0.0  ;;  %v800_v37 = vsel %vm625_vm3, %v788_v32, 0.0  ;;  %v920_v29 = vld [vmem:[%s3590_s29 + $0x8] sm:$0xff] }
 0x2e3   :  { %v817_v49 = vmul.f32 %v2141_v47, %v775_v61  ;;  %v818_v50 = vmul.f32 %v2141_v47, %v776_v62  ;;  %v819_v51 = vmul.f32 %v2141_v47, %v777_v63  ;;  %v820_v54 = vmul.f32 %v2141_v47, %v778_v6 }
 0x2e4   :  { %v793_v31 = vadd.f32 %v792_v30, %v791_v28  ;;  %v821_v55 = vmul.f32 %v2141_v47, %v779_v7  ;;  %v822_v56 = vmul.f32 %v2141_v47, %v780_v20  ;;  %v919_v28 = vld [vmem:[%s3590_s29] sm:$0xff] }
 0x2e5   :  { %v2715_v1 = vpack.c.bf16 %v920_v29, %v919_v28 }
 0x2e6   :  { %v795_v26 = vadd.f32 %v794_v9, %v793_v31  ;;  %v844_v31 = vld [vmem:[%s3591_s4] sm:$0xff]  ;;  %v921_v9 = vld [vmem:[%s3590_s29 + $0x10] sm:$0xff] }
 0x2e8   :  { %v797_v34 = vadd.f32 %v796_v33, %v795_v26  ;;  %v922_v26 = vld [vmem:[%s3590_s29 + $0x18] sm:$0xff]  ;;  %v1003_v33 = vld [vmem:[%s3546_s13] sm:$0xff] }
 0x2e9   :  { %v2718_v32 = vpack.c.bf16 %v922_v26, %v921_v9 }
 0x2ea   :  { %v799_v36 = vadd.f32 %v798_v35, %v797_v34  ;;  %v1004_v34 = vld [vmem:[%s3546_s13 + $0x8] sm:$0xff] }
 0x2eb   :  { %v2721_v35 = vpack.c.bf16 %v1004_v34, %v1003_v33  ;;  %v1331_v34 = vld [vmem:[%s3551_s18] sm:$0xff] }
 0x2ec   :  { %v801_v38 = vadd.f32 %v800_v37, %v799_v36 }
 0x2ee   :  { %v802_v39 = vrot.slane %v801_v38, 4 }
 0x2f0   :  { %v803_v40 = vadd.f32 %v802_v39, %v801_v38  ;;  %v1005_v38 = vld [vmem:[%s3546_s13 + $0x10] sm:$0xff]  ;;  %v1006_v39 = vld [vmem:[%s3546_s13 + $0x18] sm:$0xff] }
 0x2f2   :  { %v804_v41 = vrot.slane %v803_v40, 2 }
 0x2f4   :  { %v805_v42 = vadd.f32 %v804_v41, %v803_v40  ;;  %v2724_v40 = vpack.c.bf16 %v1006_v39, %v1005_v38  ;;  %v2144_v41 = vld [vmem:[%s3547_s12] ss:$0 sm:$0xff]  ;;  %v1333_v38 = vld [vmem:[%s3551_s18 + $0x10] sm:$0xff]  ;;  %v1334_v39 = vld [vmem:[%s3551_s18 + $0x18] sm:$0xff] }
 0x2f6   :  { %v806_v43 = vrot.slane %v805_v42, 1 }
 0x2f8   :  { %v807_v44 = vadd.f32 %v806_v43, %v805_v42 }
 0x2fa   :  { %v808_v45 = vmul.f32 0.017857144, %v807_v44 }
 0x2fc   :  { %v809_v46 = vadd.f32 1e-05, %v808_v45 }
 0x2fe   :  { %2761 = vrsqrt.f32 %v809_v46  ;;  %v2146_v46 = vld [vmem:[%s3548_s14] ss:$0 sm:$0xff] }
 0x308   :  { %v2762_v52 = vpop.eup %2761 }
 0x309   :  { %v830_v57 = vmul.f32 %v2762_v52, %v823_v48  ;;  %v824_v58 = vmul.f32 %v2762_v52, %v817_v49  ;;  %v825_v60 = vmul.f32 %v2762_v52, %v818_v50  ;;  %v826_v21 = vmul.f32 %v2762_v52, %v819_v51 }
 0x30a   :  { %v827_v22 = vmul.f32 %v2762_v52, %v820_v54  ;;  %v828_v23 = vmul.f32 %v2762_v52, %v821_v55  ;;  %v829_v24 = vmul.f32 %v2762_v52, %v822_v56 }
 0x30b   :  { %v3165_v25 = vadd.f32 %v2142_v53, %v824_v58  ;;  %v3167_v61 = vadd.f32 %v2142_v53, %v825_v60  ;;  %v3171_v63 = vadd.f32 %v2142_v53, %v826_v21  ;;  %v3192_v30 = vadd.f32 %v2142_v53, %v830_v57 }
 0x30c   :  { %v3173_v59 = vadd.f32 %v2142_v53, %v827_v22  ;;  %v3178_v7 = vadd.f32 %v2142_v53, %v828_v23  ;;  %v3180_v20 = vadd.f32 %v2142_v53, %v829_v24 }
 0x30d   :  { %v2706_v62 = vpack.c.bf16 %v3167_v61, %v3165_v25 }
 0x30e   :  { %v2709_v6 = vpack.c.bf16 %v3173_v59, %v3171_v63  ;;  %v2712_v27 = vpack.c.bf16 %v3180_v20, %v3178_v7 }
 0x30f   :  { %2707 = vmatpush3.bf16.msra.mxu1 %v2706_v62 }
 0x310   :  { %2708 = vmatprep.subr.bf16.mxu1 %v2769_v5 }
 0x313   :  { %2710 = vmatpush3.bf16.msra.mxu1 %v2709_v6 }
 0x314   :  { %2711 = vmatprep.subr.bf16.mxu1 %v2769_v5 }
 0x317   :  { %2713 = vmatpush3.bf16.msra.mxu1 %v2712_v27 }
 0x318   :  { %2475 = vmatprep.subr.mxu1 %v2767_v0 }
 0x31b   :  { %2476 = vmatpush3.msra.mxu1 %v3192_v30 }
 0x31c   :  { %2478 = vmatmul.mubr.msk.f32.vlgmr.msra.gmra.mrb[24].mxu1 %vm845_vm4, %v844_v31  ;;  %2714 = vmatprep.subr.bf16.mxu1 %v2769_v5 }
 0x31d   :  { %2716 = vmatpush3.bf16.msra.mxu1 %v2715_v1  ;;  %2488 = vmatprep.mubr.msk.f32.mxu1 %vm2768_vm1, %v2767_v0  ;;  %v2148_v1 = vld [vmem:[%s3549_s15] ss:$0 sm:$0xff] }
 0x31e   :  { %2717 = vmatprep.subr.bf16.mxu1 %v2769_v5 }
 0x321   :  { %2719 = vmatpush3.bf16.msra.mxu1 %v2718_v32  ;;  %v2149_v32 = vld [vmem:[%s3550_s16] ss:$0 sm:$0xff] }
 0x322   :  { %2720 = vmatprep.subr.bf16.mxu1 %v2769_v5 }
 0x3ef   :  { %v915_v36 = vpop.f32.mrb[24].mxu1 }
 0x3f0   :  { %v2479_v37 = vpop.f32.mrb[25].mxu1  ;;  %2489 = vmatmul.mubr.msk.f32.vlgmr.msra.gmra.mrb[26].mxu1 %vm625_vm3, %v915_v36 }
 0x3f1   :  { %2722 = vmatpush3.bf16.msra.mxu1 %v2721_v35  ;;  %2499 = vmatprep.mubr.msk.f32.mxu1 %vm2768_vm1, %v2767_v0  ;;  %v1332_v35 = vld [vmem:[%s3551_s18 + $0x8] sm:$0xff] }
 0x3f2   :  { %2723 = vmatprep.subr.bf16.mxu1 %v2769_v5  ;;  %v2727_v37 = vpack.c.bf16 %v1332_v35, %v1331_v34 }
 0x3f5   :  { %2725 = vmatpush3.bf16.msra.mxu1 %v2724_v40 }
 0x3f6   :  { %2502 = vmatprep.subr.mxu1 %v2767_v0 }
 0x4c3   :  { %v999_v42 = vpop.f32.mrb[26].mxu1 }
 0x4c4   :  { %v1000_v43 = vadd.f32 %v2144_v41, %v999_v42  ;;  %v2490_v44 = vpop.f32.mrb[27].mxu1 }
 0x4c6   :  { %v1010_v45 = vmax.f32 %v1000_v43, 0.0 }
 0x4c8   :  { %2500 = vmatmul.mubr.msk.f32.vlgmr.msra.gmra.mrb[28].mxu1 %vm625_vm3, %v1010_v45 }
 0x4c9   :  { %2504 = vmatprep.mubr.msk.f32.mxu1 %vm2768_vm1, %v2767_v0 }
 0x59b   :  { %v1086_v47 = vpop.f32.mrb[28].mxu1 }
 0x59c   :  { %v1087_v48 = vadd.f32 %v2146_v46, %v1086_v47  ;;  %v2501_v49 = vpop.f32.mrb[29].mxu1 }
 0x59e   :  { %v1090_v50 = vmax.f32 %v1087_v48, 0.0 }
 0x5a0   :  { %v1091_v51 = vsel %vm625_vm3, %v1090_v50, 0.0 }
 0x5a1   :  { %v1092_v52 = vrot.slane %v1091_v51, 4 }
 0x5a3   :  { %v1093_v53 = vadd.f32 %v1092_v52, %v1091_v51 }
 0x5a5   :  { %v1094_v54 = vrot.slane %v1093_v53, 2 }
 0x5a7   :  { %v1095_v55 = vadd.f32 %v1094_v54, %v1093_v53 }
 0x5a9   :  { %v1096_v56 = vrot.slane %v1095_v55, 1 }
 0x5ab   :  { %v1097_v57 = vadd.f32 %v1096_v56, %v1095_v55 }
 0x5ad   :  { %v1099_v58 = vmul.f32 0.125, %v1097_v57 }
 0x5af   :  { %v1100_v60 = vsub.f32 %v1090_v50, %v1099_v58 }
 0x5b1   :  { %v1101_v21 = vmul.f32 %v1100_v60, %v1100_v60  ;;  %v1118_v9 = vmul.f32 %v2148_v1, %v1100_v60 }
 0x5b3   :  { %v1102_v22 = vsel %vm625_vm3, %v1101_v21, 0.0 }
 0x5b4   :  { %v1103_v23 = vrot.slane %v1102_v22, 4 }
 0x5b6   :  { %v1104_v24 = vadd.f32 %v1103_v23, %v1102_v22 }
 0x5b8   :  { %v1105_v62 = vrot.slane %v1104_v24, 2 }
 0x5ba   :  { %v1106_v6 = vadd.f32 %v1105_v62, %v1104_v24 }
 0x5bc   :  { %v1107_v27 = vrot.slane %v1106_v6, 1 }
 0x5be   :  { %v1108_v28 = vadd.f32 %v1107_v27, %v1106_v6 }
 0x5c0   :  { %v1109_v29 = vmul.f32 0.125, %v1108_v28 }
 0x5c2   :  { %v1110_v31 = vadd.f32 1e-05, %v1109_v29 }
 0x5c4   :  { %2763 = vrsqrt.f32 %v1110_v31 }
 0x5ce   :  { %v2764_v26 = vpop.eup %2763 }
 0x5cf   :  { %v1119_v33 = vmul.f32 %v2764_v26, %v1118_v9 }
 0x5d1   :  { %v1126_v36 = vadd.f32 %v2149_v32, %v1119_v33 }
 0x5d3   :  { %2503 = vmatpush3.msra.mxu1 %v1126_v36  ;;  %2526 = vmatpush3.msra.mxu0 %v1126_v36 }
 0x5d4   :  { %2528 = vmatmul.mubr.msk.f32.vlgmr.msra.gmra.mrb[46].mxu0 %vm101_vm0, %v3040_v18  ;;  %2505 = vmatmul.mubr.msk.f32.vlgmr.msra.gmra.mrb[30].mxu1 %vm101_vm0, %v2919_v2  ;;  %v2730_v2 = vpack.c.bf16 %v1334_v39, %v1333_v38 }
 0x5d5   :  { %2530 = vmatprep.mubr.msk.f32.mxu0 %vm2768_vm1, %v2767_v0  ;;  %2507 = vmatprep.mubr.msk.f32.mxu1 %vm2768_vm1, %v2767_v0 }
 0x5d6   :  { %2726 = vmatprep.subr.bf16.mxu1 %v2769_v5  ;;  %2732 = vmatprep.subr.bf16.mxu0 %v2769_v5 }
 0x5d7   :  { %2728 = vmatpush3.bf16.msra.mxu1 %v2727_v37 }
 0x5d8   :  { %2531 = vmatmul.mubr.msk.f32.gmra.mrb[48].mxu0 %vm101_vm0, %v3049_v19  ;;  %2508 = vmatmul.mubr.msk.f32.gmra.mrb[32].mxu1 %vm101_vm0, %v2930_v3  ;;  %v1327_v3 = vld [vmem:[%s3552_s17] sm:$0xff] }
 0x5d9   :  { %2533 = vmatprep.mubr.msk.f32.mxu0 %vm2768_vm1, %v2767_v0  ;;  %2510 = vmatprep.mubr.msk.f32.mxu1 %vm2768_vm1, %v2767_v0 }
 0x5da   :  { %2729 = vmatprep.subr.bf16.mxu1 %v2769_v5 }
 0x5db   :  { %2731 = vmatpush3.bf16.msra.mxu1 %v2730_v2 }
 0x5dc   :  { %2534 = vmatmul.mubr.msk.f32.gmra.mrb[50].mxu0 %vm101_vm0, %v2935_v4  ;;  %2511 = vmatmul.mubr.msk.f32.gmra.mrb[34].mxu1 %vm101_vm0, %v2962_v10  ;;  %v1328_v4 = vld [vmem:[%s3552_s17 + $0x8] sm:$0xff]  ;;  %v1329_v10 = vld [vmem:[%s3552_s17 + $0x10] sm:$0xff] }
 0x5dd   :  { %2536 = vmatprep.mubr.msk.f32.mxu0 %vm2768_vm1, %v2767_v0  ;;  %2513 = vmatprep.mubr.msk.f32.mxu1 %vm2768_vm1, %v2767_v0 }
 0x5de   :  { %2738 = vmatprep.subr.bf16.mxu1 %v2769_v5 }
 0x5e0   :  { %2537 = vmatmul.mubr.msk.f32.gmra.mrb[52].mxu0 %vm101_vm0, %v2955_v8  ;;  %2514 = vmatmul.mubr.msk.f32.gmra.mrb[36].mxu1 %vm101_vm0, %v2982_v12  ;;  %v2733_v8 = vpack.c.bf16 %v1328_v4, %v1327_v3 }
 0x5e1   :  { %2539 = vmatprep.mubr.msk.f32.mxu0 %vm2768_vm1, %v2767_v0  ;;  %2516 = vmatprep.mubr.msk.f32.mxu1 %vm2768_vm1, %v2767_v0 }
 0x5e2   :  { %2734 = vmatpush3.bf16.msra.mxu0 %v2733_v8 }
 0x5e3   :  { %2735 = vmatprep.subr.bf16.mxu0 %v2769_v5 }
 0x5e4   :  { %2540 = vmatmul.mubr.msk.f32.gmra.mrb[54].mxu0 %vm101_vm0, %v2975_v11  ;;  %2517 = vmatmul.mubr.msk.f32.gmra.mrb[38].mxu1 %vm101_vm0, %v3000_v14  ;;  %v1330_v11 = vld [vmem:[%s3552_s17 + $0x18] sm:$0xff]  ;;  %v1578_v14 = vld [vmem:[%s3553_s19 + $0x8] sm:$0xff] }
 0x5e5   :  { %2542 = vmatprep.mubr.msk.f32.mxu0 %vm2768_vm1, %v2767_v0  ;;  %2519 = vmatprep.mubr.msk.f32.mxu1 %vm2768_vm1, %v2767_v0  ;;  %v2736_v12 = vpack.c.bf16 %v1330_v11, %v1329_v10 }
 0x5e7   :  { %2737 = vmatpush3.bf16.msra.mxu0 %v2736_v12 }
 0x5e8   :  { %2543 = vmatmul.mubr.msk.f32.gmra.mrb[56].mxu0 %vm101_vm0, %v2993_v13  ;;  %2520 = vmatmul.mubr.msk.f32.gmra.mrb[40].mxu1 %vm101_vm0, %v3018_v16  ;;  %v1577_v13 = vld [vmem:[%s3553_s19] sm:$0xff]  ;;  %v1579_v16 = vld [vmem:[%s3553_s19 + $0x10] sm:$0xff] }
 0x5e9   :  { %2545 = vmatprep.mubr.msk.f32.mxu0 %vm2768_vm1, %v2767_v0  ;;  %2522 = vmatprep.mubr.msk.f32.mxu1 %vm2768_vm1, %v2767_v0 }
 0x5ea   :  { %2744 = vmatprep.subr.bf16.mxu0 %v2769_v5 }
 0x5ec   :  { %2546 = vmatmul.mubr.msk.f32.gmra.mrb[58].mxu0 %vm101_vm0, %v3011_v15  ;;  %2523 = vmatmul.mubr.msk.f32.gmra.mrb[42].mxu1 %vm101_vm0, %v3031_v17  ;;  %v2739_v15 = vpack.c.bf16 %v1578_v14, %v1577_v13  ;;  %v1580_v17 = vld [vmem:[%s3553_s19 + $0x18] sm:$0xff] }
 0x5ed   :  { %2556 = vmatprep.mubr.msk.f32.mxu1 %vm2768_vm1, %v2767_v0  ;;  %2585 = vmatprep.mubr.msk.f32.mxu0 %vm2768_vm1, %v2767_v0  ;;  %v2742_v42 = vpack.c.bf16 %v1580_v17, %v1579_v16 }
 0x6a7   :  { %v1293_v18 = vpop.f32.mrb[46].mxu0  ;;  %v1193_v19 = vpop.f32.mrb[30].mxu1 }
 0x6a8   :  { %2557 = vmatmul.mubr.msk.f32.vlgmr.msra.gmra.mrb[44].mxu1 %vm625_vm3, %v1293_v18  ;;  %v2529_v40 = vpop.f32.mrb[47].mxu0  ;;  %2586 = vmatmul.mubr.msk.f32.vlgmr.msra.gmra.mrb[60].mxu0 %vm625_vm3, %v1193_v19  ;;  %v2506_v41 = vpop.f32.mrb[31].mxu1 }
 0x6a9   :  { %2559 = vmatprep.mubr.msk.f32.mxu1 %vm2768_vm1, %v2767_v0  ;;  %2740 = vmatpush3.bf16.msra.mxu1 %v2739_v15 }
 0x6aa   :  { %2741 = vmatprep.subr.bf16.mxu1 %v2769_v5  ;;  %2588 = vmatprep.mubr.msk.f32.mxu0 %vm2768_vm1, %v2767_v0 }
 0x6ab   :  { %v1298_v43 = vpop.f32.mrb[48].mxu0  ;;  %v1198_v44 = vpop.f32.mrb[32].mxu1 }
 0x6ac   :  { %2560 = vmatmul.mubr.msk.f32.gmra.mrb[46].mxu1 %vm625_vm3, %v1298_v43  ;;  %v2532_v45 = vpop.f32.mrb[49].mxu0  ;;  %2589 = vmatmul.mubr.msk.f32.gmra.mrb[62].mxu0 %vm625_vm3, %v1198_v44  ;;  %v2509_v46 = vpop.f32.mrb[33].mxu1 }
 0x6ad   :  { %2562 = vmatprep.mubr.msk.f32.mxu1 %vm2768_vm1, %v2767_v0  ;;  %2743 = vmatpush3.bf16.msra.mxu1 %v2742_v42 }
 0x6ae   :  { %2591 = vmatprep.mubr.msk.f32.mxu0 %vm2768_vm1, %v2767_v0  ;;  %2750 = vmatprep.subr.bf16.mxu1 %v2769_v5 }
 0x6af   :  { %v1303_v47 = vpop.f32.mrb[50].mxu0  ;;  %v1203_v48 = vpop.f32.mrb[34].mxu1 }
 0x6b0   :  { %2563 = vmatmul.mubr.msk.f32.gmra.mrb[48].mxu1 %vm625_vm3, %v1303_v47  ;;  %v2535_v49 = vpop.f32.mrb[51].mxu0  ;;  %2592 = vmatmul.mubr.msk.f32.gmra.mrb[64].mxu0 %vm625_vm3, %v1203_v48  ;;  %v2512_v50 = vpop.f32.mrb[35].mxu1  ;;  %v2185_v47 = vld [vmem:[%s3555_s20] ss:$0 sm:$0xff] }
 0x6b1   :  { %2565 = vmatprep.mubr.msk.f32.mxu1 %vm2768_vm1, %v2767_v0  ;;  %2594 = vmatprep.mubr.msk.f32.mxu0 %vm2768_vm1, %v2767_v0 }
 0x6b3   :  { %v1308_v51 = vpop.f32.mrb[52].mxu0  ;;  %v1208_v52 = vpop.f32.mrb[36].mxu1 }
 0x6b4   :  { %2566 = vmatmul.mubr.msk.f32.gmra.mrb[50].mxu1 %vm625_vm3, %v1308_v51  ;;  %v2538_v53 = vpop.f32.mrb[53].mxu0  ;;  %2595 = vmatmul.mubr.msk.f32.gmra.mrb[66].mxu0 %vm625_vm3, %v1208_v52  ;;  %v2515_v54 = vpop.f32.mrb[37].mxu1 }
 0x6b5   :  { %2568 = vmatprep.mubr.msk.f32.mxu1 %vm2768_vm1, %v2767_v0  ;;  %2597 = vmatprep.mubr.msk.f32.mxu0 %vm2768_vm1, %v2767_v0 }
 0x6b7   :  { %v1313_v55 = vpop.f32.mrb[54].mxu0  ;;  %v1213_v56 = vpop.f32.mrb[38].mxu1 }
 0x6b8   :  { %2569 = vmatmul.mubr.msk.f32.gmra.mrb[52].mxu1 %vm625_vm3, %v1313_v55  ;;  %v2541_v57 = vpop.f32.mrb[55].mxu0  ;;  %2598 = vmatmul.mubr.msk.f32.gmra.mrb[68].mxu0 %vm625_vm3, %v1213_v56  ;;  %v2518_v58 = vpop.f32.mrb[39].mxu1 }
 0x6b9   :  { %2571 = vmatprep.mubr.msk.f32.mxu1 %vm2768_vm1, %v2767_v0  ;;  %2600 = vmatprep.mubr.msk.f32.mxu0 %vm2768_vm1, %v2767_v0 }
 0x6bb   :  { %v1318_v60 = vpop.f32.mrb[56].mxu0  ;;  %v1218_v21 = vpop.f32.mrb[40].mxu1 }
 0x6bc   :  { %2572 = vmatmul.mubr.msk.f32.gmra.mrb[54].mxu1 %vm625_vm3, %v1318_v60  ;;  %v2544_v22 = vpop.f32.mrb[57].mxu0  ;;  %2601 = vmatmul.mubr.msk.f32.gmra.mrb[70].mxu0 %vm625_vm3, %v1218_v21  ;;  %v2521_v23 = vpop.f32.mrb[41].mxu1 }
 0x6bd   :  { %2574 = vmatprep.mubr.msk.f32.mxu1 %vm2768_vm1, %v2767_v0  ;;  %2603 = vmatprep.mubr.msk.f32.mxu0 %vm2768_vm1, %v2767_v0 }
 0x6bf   :  { %v1323_v24 = vpop.f32.mrb[58].mxu0  ;;  %v1223_v62 = vpop.f32.mrb[42].mxu1 }
 0x6c0   :  { %2575 = vmatmul.mubr.msk.f32.gmra.mrb[56].mxu1 %vm625_vm3, %v1323_v24  ;;  %v2547_v6 = vpop.f32.mrb[59].mxu0  ;;  %2604 = vmatmul.mubr.msk.f32.gmra.mrb[72].mxu0 %vm625_vm3, %v1223_v62  ;;  %v2524_v27 = vpop.f32.mrb[43].mxu1 }
 0x6c1   :  { %2614 = vmatprep.mubr.msk.f32.mxu1 %vm2768_vm1, %v2767_v0  ;;  %2643 = vmatprep.mubr.msk.f32.mxu0 %vm2768_vm1, %v2767_v0 }
 0x6c4   :  { %2615 = vmatmul.mubr.msk.f32.vlgmr.msra.gmra.mrb[58].mxu1 %vm625_vm3, %v3165_v25  ;;  %v1723_v25 = vld [vmem:[%s3554_s21] sm:$0xff] }
 0x6c5   :  { %2617 = vmatprep.mubr.msk.f32.mxu1 %vm2768_vm1, %v2767_v0 }
 0x6c8   :  { %2618 = vmatmul.mubr.msk.f32.gmra.mrb[60].mxu1 %vm625_vm3, %v3167_v61  ;;  %v1724_v61 = vld [vmem:[%s3554_s21 + $0x8] sm:$0xff] }
 0x6c9   :  { %2620 = vmatprep.mubr.msk.f32.mxu1 %vm2768_vm1, %v2767_v0 }
 0x6cc   :  { %2621 = vmatmul.mubr.msk.f32.gmra.mrb[62].mxu1 %vm625_vm3, %v3171_v63  ;;  %v2745_v63 = vpack.c.bf16 %v1724_v61, %v1723_v25 }
 0x6cd   :  { %2623 = vmatprep.mubr.msk.f32.mxu1 %vm2768_vm1, %v2767_v0 }
 0x6ce   :  { %2746 = vmatpush3.bf16.msra.mxu0 %v2745_v63 }
 0x6cf   :  { %2747 = vmatprep.subr.bf16.mxu0 %v2769_v5 }
 0x6d0   :  { %2624 = vmatmul.mubr.msk.f32.gmra.mrb[64].mxu1 %vm625_vm3, %v3173_v59  ;;  %v1725_v59 = vld [vmem:[%s3554_s21 + $0x10] sm:$0xff] }
 0x6d1   :  { %2626 = vmatprep.mubr.msk.f32.mxu1 %vm2768_vm1, %v2767_v0 }
 0x6d4   :  { %2627 = vmatmul.mubr.msk.f32.gmra.mrb[66].mxu1 %vm625_vm3, %v3178_v7  ;;  %v1726_v7 = vld [vmem:[%s3554_s21 + $0x18] sm:$0xff] }
 0x6d5   :  { %2629 = vmatprep.mubr.msk.f32.mxu1 %vm2768_vm1, %v2767_v0 }
 0x6d8   :  { %2630 = vmatmul.mubr.msk.f32.gmra.mrb[68].mxu1 %vm625_vm3, %v3180_v20  ;;  %v2748_v20 = vpack.c.bf16 %v1726_v7, %v1725_v59 }
 0x6d9   :  { %2632 = vmatprep.mubr.msk.f32.mxu1 %vm2768_vm1, %v2767_v0 }
 0x6da   :  { %2749 = vmatpush3.bf16.msra.mxu0 %v2748_v20 }
 0x6dc   :  { %2633 = vmatmul.mubr.msk.f32.gmra.mrb[70].mxu1 %vm625_vm3, %v3192_v30 }
 0x6dd   :  { %2672 = vmatprep.mubr.msk.f32.mxu1 %vm2768_vm1, %v2767_v0 }
 0x77b   :  { %v1422_v30 = vpop.f32.mrb[44].mxu1  ;;  %v1543_v28 = vpop.f32.mrb[60].mxu0 }
 0x77c   :  { %v2558_v29 = vpop.f32.mrb[45].mxu1  ;;  %v1544_v31 = vadd.f32 %v1543_v28, %v1422_v30  ;;  %v2587_v1 = vpop.f32.mrb[61].mxu0 }
 0x77f   :  { %v1427_v9 = vpop.f32.mrb[46].mxu1  ;;  %v1548_v26 = vpop.f32.mrb[62].mxu0 }
 0x780   :  { %v2561_v32 = vpop.f32.mrb[47].mxu1  ;;  %v1549_v33 = vadd.f32 %v1548_v26, %v1427_v9  ;;  %v2590_v34 = vpop.f32.mrb[63].mxu0 }
 0x781   :  { %v1960_v34 = vld [vmem:[%s3556_s25] sm:$0xff] }
 0x783   :  { %v1432_v35 = vpop.f32.mrb[48].mxu1  ;;  %v1553_v36 = vpop.f32.mrb[64].mxu0 }
 0x784   :  { %v2564_v37 = vpop.f32.mrb[49].mxu1  ;;  %v1554_v38 = vadd.f32 %v1553_v36, %v1432_v35  ;;  %v2593_v39 = vpop.f32.mrb[65].mxu0  ;;  %v1961_v35 = vld [vmem:[%s3556_s25 + $0x8] sm:$0xff] }
 0x785   :  { %v2751_v36 = vpack.c.bf16 %v1961_v35, %v1960_v34  ;;  %v1962_v37 = vld [vmem:[%s3556_s25 + $0x10] sm:$0xff] }
 0x787   :  { %v1437_v2 = vpop.f32.mrb[50].mxu1  ;;  %v1558_v3 = vpop.f32.mrb[66].mxu0  ;;  %2752 = vmatpush3.bf16.msra.mxu1 %v2751_v36 }
 0x788   :  { %v2567_v4 = vpop.f32.mrb[51].mxu1  ;;  %v1559_v8 = vadd.f32 %v1558_v3, %v1437_v2  ;;  %v2596_v10 = vpop.f32.mrb[67].mxu0  ;;  %2753 = vmatprep.subr.bf16.mxu1 %v2769_v5  ;;  %v2186_v2 = vld [vmem:[%s3557_s22] ss:$0 sm:$0xff] }
 0x78b   :  { %v1442_v11 = vpop.f32.mrb[52].mxu1  ;;  %v1563_v12 = vpop.f32.mrb[68].mxu0 }
 0x78c   :  { %v2570_v13 = vpop.f32.mrb[53].mxu1  ;;  %v1564_v14 = vadd.f32 %v1563_v12, %v1442_v11  ;;  %v2599_v15 = vpop.f32.mrb[69].mxu0 }
 0x78f   :  { %v1447_v16 = vpop.f32.mrb[54].mxu1  ;;  %v1568_v17 = vpop.f32.mrb[70].mxu0 }
 0x790   :  { %v2573_v18 = vpop.f32.mrb[55].mxu1  ;;  %v1569_v19 = vadd.f32 %v1568_v17, %v1447_v16  ;;  %v2602_v40 = vpop.f32.mrb[71].mxu0 }
 0x793   :  { %v1452_v41 = vpop.f32.mrb[56].mxu1  ;;  %v1573_v42 = vpop.f32.mrb[72].mxu0 }
 0x794   :  { %v2576_v43 = vpop.f32.mrb[57].mxu1  ;;  %v1574_v44 = vadd.f32 %v1573_v42, %v1452_v41  ;;  %v2605_v45 = vpop.f32.mrb[73].mxu0 }
 0x797   :  { %v1668_v46 = vpop.f32.mrb[58].mxu1 }
 0x798   :  { %v1702_v48 = vadd.f32 %v1668_v46, %v1544_v31  ;;  %v2616_v49 = vpop.f32.mrb[59].mxu1 }
 0x79a   :  { %v1716_v50 = vadd.f32 %v2185_v47, %v1702_v48 }
 0x79b   :  { %v1673_v51 = vpop.f32.mrb[60].mxu1 }
 0x79c   :  { %v1730_v52 = vmax.f32 %v1716_v50, 0.0  ;;  %v1703_v53 = vadd.f32 %v1673_v51, %v1549_v33  ;;  %v2619_v54 = vpop.f32.mrb[61].mxu1 }
 0x79e   :  { %v1717_v55 = vadd.f32 %v2185_v47, %v1703_v53  ;;  %2644 = vmatmul.mubr.msk.f32.vlgmr.msra.gmra.mrb[74].mxu0 %vm625_vm3, %v1730_v52 }
 0x79f   :  { %v1678_v56 = vpop.f32.mrb[62].mxu1  ;;  %2646 = vmatprep.mubr.msk.f32.mxu0 %vm2768_vm1, %v2767_v0 }
 0x7a0   :  { %v1731_v57 = vmax.f32 %v1717_v55, 0.0  ;;  %v1704_v58 = vadd.f32 %v1678_v56, %v1554_v38  ;;  %v2622_v60 = vpop.f32.mrb[63].mxu1  ;;  %v1963_v38 = vld [vmem:[%s3556_s25 + $0x18] sm:$0xff] }
 0x7a1   :  { %v2754_v39 = vpack.c.bf16 %v1963_v38, %v1962_v37 }
 0x7a2   :  { %v1718_v21 = vadd.f32 %v2185_v47, %v1704_v58  ;;  %2647 = vmatmul.mubr.msk.f32.gmra.mrb[76].mxu0 %vm625_vm3, %v1731_v57 }
 0x7a3   :  { %v1683_v22 = vpop.f32.mrb[64].mxu1  ;;  %2649 = vmatprep.mubr.msk.f32.mxu0 %vm2768_vm1, %v2767_v0  ;;  %2755 = vmatpush3.bf16.msra.mxu1 %v2754_v39 }
 0x7a4   :  { %v1732_v23 = vmax.f32 %v1718_v21, 0.0  ;;  %v1705_v24 = vadd.f32 %v1683_v22, %v1559_v8  ;;  %v2625_v62 = vpop.f32.mrb[65].mxu1 }
 0x7a6   :  { %v1719_v6 = vadd.f32 %v2185_v47, %v1705_v24  ;;  %2650 = vmatmul.mubr.msk.f32.gmra.mrb[78].mxu0 %vm625_vm3, %v1732_v23 }
 0x7a7   :  { %v1688_v27 = vpop.f32.mrb[66].mxu1  ;;  %2652 = vmatprep.mubr.msk.f32.mxu0 %vm2768_vm1, %v2767_v0 }
 0x7a8   :  { %v1733_v25 = vmax.f32 %v1719_v6, 0.0  ;;  %v1706_v61 = vadd.f32 %v1688_v27, %v1564_v14  ;;  %v2628_v63 = vpop.f32.mrb[67].mxu1 }
 0x7aa   :  { %v1720_v59 = vadd.f32 %v2185_v47, %v1706_v61  ;;  %2653 = vmatmul.mubr.msk.f32.gmra.mrb[80].mxu0 %vm625_vm3, %v1733_v25 }
 0x7ab   :  { %v1693_v7 = vpop.f32.mrb[68].mxu1  ;;  %2655 = vmatprep.mubr.msk.f32.mxu0 %vm2768_vm1, %v2767_v0 }
 0x7ac   :  { %v1734_v20 = vmax.f32 %v1720_v59, 0.0  ;;  %v1707_v30 = vadd.f32 %v1693_v7, %v1569_v19  ;;  %v2631_v28 = vpop.f32.mrb[69].mxu1 }
 0x7ae   :  { %v1721_v29 = vadd.f32 %v2185_v47, %v1707_v30  ;;  %2656 = vmatmul.mubr.msk.f32.gmra.mrb[82].mxu0 %vm625_vm3, %v1734_v20 }
 0x7af   :  { %v1698_v31 = vpop.f32.mrb[70].mxu1  ;;  %2658 = vmatprep.mubr.msk.f32.mxu0 %vm2768_vm1, %v2767_v0 }
 0x7b0   :  { %v1735_v1 = vmax.f32 %v1721_v29, 0.0  ;;  %v1708_v9 = vadd.f32 %v1698_v31, %v1574_v44  ;;  %v2634_v26 = vpop.f32.mrb[71].mxu1 }
 0x7b2   :  { %v1722_v32 = vadd.f32 %v2185_v47, %v1708_v9  ;;  %2659 = vmatmul.mubr.msk.f32.gmra.mrb[84].mxu0 %vm625_vm3, %v1735_v1 }
 0x7b3   :  { %2661 = vmatprep.mubr.msk.f32.mxu0 %vm2768_vm1, %v2767_v0 }
 0x7b4   :  { %v1736_v33 = vmax.f32 %v1722_v32, 0.0 }
 0x7b6   :  { %2662 = vmatmul.mubr.msk.f32.gmra.mrb[86].mxu0 %vm625_vm3, %v1736_v33 }
 0x871   :  { %v1830_v3 = vpop.f32.mrb[74].mxu0 }
 0x872   :  { %v1831_v4 = vadd.f32 %v2186_v2, %v1830_v3  ;;  %v2645_v8 = vpop.f32.mrb[75].mxu0 }
 0x874   :  { %v1864_v11 = vmax.f32 %v1831_v4, 0.0 }
 0x875   :  { %v1835_v10 = vpop.f32.mrb[76].mxu0 }
 0x876   :  { %v1836_v12 = vadd.f32 %v2186_v2, %v1835_v10  ;;  %v2648_v13 = vpop.f32.mrb[77].mxu0  ;;  %v1871_v16 = vsel %vm625_vm3, %v1864_v11, 0.0 }
 0x878   :  { %v1865_v14 = vmax.f32 %v1836_v12, 0.0 }
 0x879   :  { %v1840_v15 = vpop.f32.mrb[78].mxu0 }
 0x87a   :  { %v1872_v17 = vsel %vm625_vm3, %v1865_v14, 0.0  ;;  %v1841_v18 = vadd.f32 %v2186_v2, %v1840_v15  ;;  %v2651_v5 = vpop.f32.mrb[79].mxu0 }
 0x87b   :  { %v1873_v19 = vadd.f32 %v1872_v17, %v1871_v16 }
 0x87c   :  { %v1866_v40 = vmax.f32 %v1841_v18, 0.0 }
 0x87d   :  { %v1845_v41 = vpop.f32.mrb[80].mxu0 }
 0x87e   :  { %v1874_v42 = vsel %vm625_vm3, %v1866_v40, 0.0  ;;  %v1846_v43 = vadd.f32 %v2186_v2, %v1845_v41  ;;  %v2654_v44 = vpop.f32.mrb[81].mxu0 }
 0x87f   :  { %v1875_v45 = vadd.f32 %v1874_v42, %v1873_v19 }
 0x880   :  { %v1867_v46 = vmax.f32 %v1846_v43, 0.0 }
 0x881   :  { %v1850_v47 = vpop.f32.mrb[82].mxu0 }
 0x882   :  { %v1876_v48 = vsel %vm625_vm3, %v1867_v46, 0.0  ;;  %v1851_v49 = vadd.f32 %v2186_v2, %v1850_v47  ;;  %v2657_v50 = vpop.f32.mrb[83].mxu0 }
 0x883   :  { %v1877_v51 = vadd.f32 %v1876_v48, %v1875_v45 }
 0x884   :  { %v1868_v52 = vmax.f32 %v1851_v49, 0.0 }
 0x885   :  { %v1855_v53 = vpop.f32.mrb[84].mxu0 }
 0x886   :  { %v1878_v54 = vsel %vm625_vm3, %v1868_v52, 0.0  ;;  %v1856_v55 = vadd.f32 %v2186_v2, %v1855_v53  ;;  %v2660_v56 = vpop.f32.mrb[85].mxu0 }
 0x887   :  { %v1879_v57 = vadd.f32 %v1878_v54, %v1877_v51 }
 0x888   :  { %v1869_v58 = vmax.f32 %v1856_v55, 0.0 }
 0x889   :  { %v1860_v60 = vpop.f32.mrb[86].mxu0 }
 0x88a   :  { %v1880_v21 = vsel %vm625_vm3, %v1869_v58, 0.0  ;;  %v1861_v22 = vadd.f32 %v2186_v2, %v1860_v60  ;;  %v2663_v23 = vpop.f32.mrb[87].mxu0 }
 0x88b   :  { %v1881_v24 = vadd.f32 %v1880_v21, %v1879_v57 }
 0x88c   :  { %v1870_v62 = vmax.f32 %v1861_v22, 0.0 }
 0x88e   :  { %v1882_v6 = vsel %vm625_vm3, %v1870_v62, 0.0 }
 0x88f   :  { %v1883_v27 = vadd.f32 %v1882_v6, %v1881_v24 }
 0x891   :  { %v1884_v25 = vrot.slane %v1883_v27, 4 }
 0x893   :  { %v1885_v61 = vadd.f32 %v1884_v25, %v1883_v27 }
 0x895   :  { %v1886_v63 = vrot.slane %v1885_v61, 2 }
 0x897   :  { %v1887_v59 = vadd.f32 %v1886_v63, %v1885_v61 }
 0x899   :  { %v1888_v7 = vrot.slane %v1887_v59, 1 }
 0x89b   :  { %v1889_v20 = vadd.f32 %v1888_v7, %v1887_v59  ;;  %v2196_v59 = vld [vmem:[%s3560_s26] ss:$0 sm:$0xff] }
 0x89d   :  { %v1890_v30 = vmul.f32 0.017857144, %v1889_v20 }
 0x89f   :  { %v1891_v28 = vsub.f32 %v1864_v11, %v1890_v30  ;;  %v1892_v29 = vsub.f32 %v1865_v14, %v1890_v30  ;;  %v1893_v31 = vsub.f32 %v1866_v40, %v1890_v30  ;;  %v1894_v1 = vsub.f32 %v1867_v46, %v1890_v30  ;;  %v2194_v46 = vld [vmem:[%s3558_s23] ss:$0 sm:$0xff] }
 0x8a0   :  { %v1895_v9 = vsub.f32 %v1868_v52, %v1890_v30  ;;  %v1896_v26 = vsub.f32 %v1869_v58, %v1890_v30  ;;  %v1897_v32 = vsub.f32 %v1870_v62, %v1890_v30  ;;  %v2195_v52 = vld [vmem:[%s3559_s24] ss:$0 sm:$0xff] }
 0x8a1   :  { %v1898_v33 = vmul.f32 %v1891_v28, %v1891_v28  ;;  %v1899_v34 = vmul.f32 %v1892_v29, %v1892_v29  ;;  %v1900_v35 = vmul.f32 %v1893_v31, %v1893_v31  ;;  %v1901_v36 = vmul.f32 %v1894_v1, %v1894_v1 }
 0x8a2   :  { %v1902_v2 = vmul.f32 %v1895_v9, %v1895_v9  ;;  %v1903_v8 = vmul.f32 %v1896_v26, %v1896_v26  ;;  %v1904_v12 = vmul.f32 %v1897_v32, %v1897_v32  ;;  %v1939_v47 = vmul.f32 %v2194_v46, %v1897_v32 }
 0x8a3   :  { %v1905_v37 = vsel %vm625_vm3, %v1898_v33, 0.0  ;;  %v1906_v38 = vsel %vm625_vm3, %v1899_v34, 0.0  ;;  %v1908_v3 = vsel %vm625_vm3, %v1900_v35, 0.0  ;;  %v1910_v10 = vsel %vm625_vm3, %v1901_v36, 0.0 }
 0x8a4   :  { %v1907_v39 = vadd.f32 %v1906_v38, %v1905_v37  ;;  %v1912_v13 = vsel %vm625_vm3, %v1902_v2, 0.0  ;;  %v1914_v15 = vsel %vm625_vm3, %v1903_v8, 0.0  ;;  %v1916_v17 = vsel %vm625_vm3, %v1904_v12, 0.0 }
 0x8a5   :  { %v1933_v48 = vmul.f32 %v2194_v46, %v1891_v28  ;;  %v1934_v49 = vmul.f32 %v2194_v46, %v1892_v29  ;;  %v1935_v50 = vmul.f32 %v2194_v46, %v1893_v31  ;;  %v1936_v53 = vmul.f32 %v2194_v46, %v1894_v1 }
 0x8a6   :  { %v1909_v4 = vadd.f32 %v1908_v3, %v1907_v39  ;;  %v1937_v54 = vmul.f32 %v2194_v46, %v1895_v9  ;;  %v1938_v55 = vmul.f32 %v2194_v46, %v1896_v26 }
 0x8a8   :  { %v1911_v11 = vadd.f32 %v1910_v10, %v1909_v4 }
 0x8aa   :  { %v1913_v14 = vadd.f32 %v1912_v13, %v1911_v11 }
 0x8ac   :  { %v1915_v16 = vadd.f32 %v1914_v15, %v1913_v14 }
 0x8ae   :  { %v1917_v18 = vadd.f32 %v1916_v17, %v1915_v16 }
 0x8b0   :  { %v1918_v5 = vrot.slane %v1917_v18, 4 }
 0x8b2   :  { %v1919_v19 = vadd.f32 %v1918_v5, %v1917_v18 }
 0x8b4   :  { %v1920_v40 = vrot.slane %v1919_v19, 2 }
 0x8b6   :  { %v1921_v41 = vadd.f32 %v1920_v40, %v1919_v19 }
 0x8b8   :  { %v1922_v42 = vrot.slane %v1921_v41, 1 }
 0x8ba   :  { %v1923_v43 = vadd.f32 %v1922_v42, %v1921_v41 }
 0x8bc   :  { %v1924_v44 = vmul.f32 0.017857144, %v1923_v43 }
 0x8be   :  { %v1925_v45 = vadd.f32 1e-05, %v1924_v44 }
 0x8c0   :  { %2765 = vrsqrt.f32 %v1925_v45 }
 0x8ca   :  { %v2766_v51 = vpop.eup %2765 }
 0x8cb   :  { %v1946_v56 = vmul.f32 %v2766_v51, %v1939_v47  ;;  %v1940_v57 = vmul.f32 %v2766_v51, %v1933_v48  ;;  %v1941_v58 = vmul.f32 %v2766_v51, %v1934_v49  ;;  %v1942_v60 = vmul.f32 %v2766_v51, %v1935_v50 }
 0x8cc   :  { %v1943_v21 = vmul.f32 %v2766_v51, %v1936_v53  ;;  %v1944_v22 = vmul.f32 %v2766_v51, %v1937_v54  ;;  %v1945_v23 = vmul.f32 %v2766_v51, %v1938_v55 }
 0x8cd   :  { %v1953_v24 = vadd.f32 %v2195_v52, %v1940_v57  ;;  %v1954_v62 = vadd.f32 %v2195_v52, %v1941_v58  ;;  %v1955_v6 = vadd.f32 %v2195_v52, %v1942_v60  ;;  %v1959_v63 = vadd.f32 %v2195_v52, %v1946_v56 }
 0x8ce   :  { %v1956_v27 = vadd.f32 %v2195_v52, %v1943_v21  ;;  %v1957_v25 = vadd.f32 %v2195_v52, %v1944_v22  ;;  %v1958_v61 = vadd.f32 %v2195_v52, %v1945_v23 }
 0x8cf   :  { %2673 = vmatmul.mubr.msk.f32.vlgmr.msra.gmra.mrb[72].mxu1 %vm625_vm3, %v1953_v24 }
 0x8d0   :  { %2675 = vmatprep.mubr.msk.f32.mxu1 %vm2768_vm1, %v2767_v0 }
 0x8d3   :  { %2676 = vmatmul.mubr.msk.f32.gmra.mrb[74].mxu1 %vm625_vm3, %v1954_v62 }
 0x8d4   :  { %2678 = vmatprep.mubr.msk.f32.mxu1 %vm2768_vm1, %v2767_v0 }
 0x8d7   :  { %2679 = vmatmul.mubr.msk.f32.gmra.mrb[76].mxu1 %vm625_vm3, %v1955_v6 }
 0x8d8   :  { %2681 = vmatprep.mubr.msk.f32.mxu1 %vm2768_vm1, %v2767_v0 }
 0x8db   :  { %2682 = vmatmul.mubr.msk.f32.gmra.mrb[78].mxu1 %vm625_vm3, %v1956_v27 }
 0x8dc   :  { %2684 = vmatprep.mubr.msk.f32.mxu1 %vm2768_vm1, %v2767_v0 }
 0x8df   :  { %2685 = vmatmul.mubr.msk.f32.gmra.mrb[80].mxu1 %vm625_vm3, %v1957_v25 }
 0x8e0   :  { %2687 = vmatprep.mubr.msk.f32.mxu1 %vm2768_vm1, %v2767_v0 }
 0x8e3   :  { %2688 = vmatmul.mubr.msk.f32.gmra.mrb[82].mxu1 %vm625_vm3, %v1958_v61 }
 0x8e4   :  { %2690 = vmatprep.mubr.msk.f32.mxu1 %vm2768_vm1, %v2767_v0 }
 0x8e7   :  { %2691 = vmatmul.mubr.msk.f32.gmra.mrb[84].mxu1 %vm625_vm3, %v1959_v63 }
 0x9a2   :  { %v2058_v7 = vpop.f32.mrb[72].mxu1 }
 0x9a3   :  { %v2059_v20 = vadd.f32 %v2196_v59, %v2058_v7  ;;  %v2674_v30 = vpop.f32.mrb[73].mxu1 }
 0x9a5   :  { %2093 = vst.msk [vmem:[%s3561_s27] sm:$0xff] %vm2092_vm5, %v2059_v20 }
 0x9a6   :  { %v2063_v28 = vpop.f32.mrb[74].mxu1 }
 0x9a7   :  { %v2064_v29 = vadd.f32 %v2196_v59, %v2063_v28  ;;  %v2677_v31 = vpop.f32.mrb[75].mxu1 }
 0x9a9   :  { %2094 = vst.msk [vmem:[%s3561_s27 + $0x8] sm:$0xff] %vm2092_vm5, %v2064_v29 }
 0x9aa   :  { %v2068_v0 = vpop.f32.mrb[76].mxu1 }
 0x9ab   :  { %v2069_v1 = vadd.f32 %v2196_v59, %v2068_v0  ;;  %v2680_v9 = vpop.f32.mrb[77].mxu1 }
 0x9ad   :  { %2095 = vst.msk [vmem:[%s3561_s27 + $0x10] sm:$0xff] %vm2092_vm5, %v2069_v1 }
 0x9ae   :  { %v2073_v26 = vpop.f32.mrb[78].mxu1 }
 0x9af   :  { %v2074_v32 = vadd.f32 %v2196_v59, %v2073_v26  ;;  %v2683_v33 = vpop.f32.mrb[79].mxu1 }
 0x9b1   :  { %2096 = vst.msk [vmem:[%s3561_s27 + $0x18] sm:$0xff] %vm2092_vm5, %v2074_v32 }
 0x9b2   :  { %v2078_v34 = vpop.f32.mrb[80].mxu1 }
 0x9b3   :  { %v2079_v35 = vadd.f32 %v2196_v59, %v2078_v34  ;;  %v2686_v36 = vpop.f32.mrb[81].mxu1 }
 0x9b5   :  { %2097 = vst.msk [vmem:[%s3561_s27 + $0x20] sm:$0xff] %vm2092_vm5, %v2079_v35 }
 0x9b6   :  { %v2083_v37 = vpop.f32.mrb[82].mxu1 }
 0x9b7   :  { %v2084_v38 = vadd.f32 %v2196_v59, %v2083_v37  ;;  %v2689_v39 = vpop.f32.mrb[83].mxu1 }
 0x9b9   :  { %2098 = vst.msk [vmem:[%s3561_s27 + $0x28] sm:$0xff] %vm2092_vm5, %v2084_v38 }
 0x9ba   :  { %v2088_v2 = vpop.f32.mrb[84].mxu1 }
 0x9bb   :  { %v2089_v3 = vadd.f32 %v2196_v59, %v2088_v2  ;;  %v2692_v4 = vpop.f32.mrb[85].mxu1 }
 0x9bd   :  { %2099 = vst.msk [vmem:[%s3561_s27 + $0x30] sm:$0xff] %vm2092_vm5, %v2089_v3 }

</bundles_post_ra>
